<compile_context>
chip_gen: v7x
topology: tpu7x:2x2x1
jax: 0.10.0
libtpu: 0.0.40
codegen_flags: <defaults>
</compile_context>

<pallas_src>
import jax
import jax.numpy as jnp
from jax.experimental import pallas as pl
from jax.experimental.pallas import tpu as pltpu

# ----------------------------- model sizes ---------------------------------
VOCAB_SIZE = 40
EMBED_SIZE = 32          # args.embedding_size
HIDDEN_SIZE = 32         # args.lstm_hidden_size
NUM_LSTM_LAYERS = 2      # args.num_lstm_layers (kernel below is written for 2)
MAX_NUM_ARGS = 3         # max arity over tadashi.TrEnum transformations
SEQ_LEN = 8              # number of tokens in the (synthetic) schedule tree


# --------------------------- fused Pallas kernel ----------------------------
def _args_nn_kernel(tok_ref,                                   # SMEM (S,) int32
                    emb_ref,                                   # (V, E)
                    wih0_ref, whh0_ref, b0_ref,                # (E,4H) (H,4H) (1,4H)
                    wih1_ref, whh1_ref, b1_ref,                # (H,4H) (H,4H) (1,4H)
                    wlh_ref, wla_ref, blin_ref, args_ref,      # (1,H) (1,A) (1,1) (1,A)
                    out_ref,                                   # (1, 1)
                    x_scr, h1_scr):                            # (S,E), (S,H) VMEM scratch
    S = SEQ_LEN
    H = HIDDEN_SIZE

    # ---- embedding lookup: SMEM token ids -> dynamic rows of the VMEM table ----
    for t in range(S):
        tok = tok_ref[t]
        x_scr[pl.ds(t, 1), :] = emb_ref[pl.ds(tok, 1), :]

    def lstm_layer(xg, whh_ref, store_seq):
        """Run the recurrence over one layer.  xg: (S, 4H) pre-projected inputs."""
        h = jnp.zeros((1, H), jnp.float32)
        c = jnp.zeros((1, H), jnp.float32)
        for t in range(S):                       # static -> fully unrolled
            gates = xg[t:t + 1, :] + jnp.dot(
                h, whh_ref[...], preferred_element_type=jnp.float32)   # (1, 4H)
            # PyTorch gate ordering: i, f, g, o
            i_g = jax.nn.sigmoid(gates[:, 0 * H:1 * H])
            f_g = jax.nn.sigmoid(gates[:, 1 * H:2 * H])
            g_g = jnp.tanh(gates[:, 2 * H:3 * H])
            o_g = jax.nn.sigmoid(gates[:, 3 * H:4 * H])
            c = f_g * c + i_g * g_g
            h = o_g * jnp.tanh(c)
            if store_seq:
                h1_scr[pl.ds(t, 1), :] = h       # layer-0 outputs feed layer 1
        return h

    # ---- LSTM layer 0: hoisted input projection (one (S,E)@(E,4H) matmul) ----
    xg0 = jnp.dot(x_scr[...], wih0_ref[...],
                  preferred_element_type=jnp.float32) + b0_ref[...]
    lstm_layer(xg0, whh0_ref, store_seq=True)

    # ---- LSTM layer 1 (last layer; no hidden-sequence materialization) ----
    xg1 = jnp.dot(h1_scr[...], wih1_ref[...],
                  preferred_element_type=jnp.float32) + b1_ref[...]
    h_last = lstm_layer(xg1, whh1_ref, store_seq=False)         # (1, H) == h_n[-1,:]

    # ---- head: Linear(hidden + max_num_args -> 1) on hstack([h, args]) ----
    out_ref[...] = (
        jnp.sum(h_last * wlh_ref[...], axis=-1, keepdims=True)
        + jnp.sum(args_ref[...] * wla_ref[...], axis=-1, keepdims=True)
        + blin_ref[...]
    )


# --------------------------- wrapper -----------------------------------------
_VMEM = pl.BlockSpec(memory_space=pltpu.MemorySpace.VMEM)
_SMEM = pl.BlockSpec(memory_space=pltpu.MemorySpace.SMEM)


@jax.jit
def args_nn_forward(params, token_ids, args_vec):
    """Equivalent of ArgsNN.forward(node, args).

    token_ids: (SEQ_LEN,) int32  — stands in for the tokenized schedule tree.
    args_vec:  (MAX_NUM_ARGS,) float32 — transformation args, zero-padded.
    Returns: (1,) float32, matching torch Linear output on a 1-D input.
    """
    # TODO(synk): yaml/ISL tokenization (tokenize/traverse) is string processing
    # with no Pallas equivalent; token indices are provided directly.
    args_2d = args_vec.astype(jnp.float32).reshape(1, MAX_NUM_ARGS)

    out = pl.pallas_call(
        _args_nn_kernel,
        out_shape=jax.ShapeDtypeStruct((1, 1), jnp.float32),
        in_specs=[_SMEM] + [_VMEM] * 11,
        out_specs=_VMEM,
        scratch_shapes=[
            pltpu.VMEM((SEQ_LEN, EMBED_SIZE), jnp.float32),    # embedded tokens
            pltpu.VMEM((SEQ_LEN, HIDDEN_SIZE), jnp.float32),   # layer-0 hidden seq
        ],
    )(
        token_ids.astype(jnp.int32),
        params["embedding"],
        params["w_ih_0"], params["w_hh_0"], params["b_0"],
        params["w_ih_1"], params["w_hh_1"], params["b_1"],
        params["w_lin_h"], params["w_lin_a"], params["b_lin"],
        args_2d,
    )
    return out[0]                                              # (1,)


def pad_args(args_list):
    """torch.tensor(args + [0] * pad_size) with fixed length MAX_NUM_ARGS."""
    pad_size = MAX_NUM_ARGS - len(args_list)
    return jnp.asarray(list(args_list) + [0] * pad_size, dtype=jnp.float32)


def init_params(key):
    """Deterministic parameter init matching the shapes in ArgsNN.__init__."""
    ks = jax.random.split(key, 4 + 4 * NUM_LSTM_LAYERS)
    params = {}
    scale = 1.0 / jnp.sqrt(jnp.float32(HIDDEN_SIZE))

    params["embedding"] = jax.random.normal(
        ks[0], (VOCAB_SIZE, EMBED_SIZE), jnp.float32) * 0.1

    for layer in range(NUM_LSTM_LAYERS):
        in_size = EMBED_SIZE if layer == 0 else HIDDEN_SIZE
        k0, k1, k2, k3 = jax.random.split(ks[1 + layer], 4)
        # stored transposed: (in, 4H) / (H, 4H) so each step is `row @ weight`
        params[f"w_ih_{layer}"] = jax.random.uniform(
            k0, (in_size, 4 * HIDDEN_SIZE), jnp.float32, -1.0, 1.0) * scale
        params[f"w_hh_{layer}"] = jax.random.uniform(
            k1, (HIDDEN_SIZE, 4 * HIDDEN_SIZE), jnp.float32, -1.0, 1.0) * scale
        b_ih = jax.random.uniform(
            k2, (1, 4 * HIDDEN_SIZE), jnp.float32, -1.0, 1.0) * scale
        b_hh = jax.random.uniform(
            k3, (1, 4 * HIDDEN_SIZE), jnp.float32, -1.0, 1.0) * scale
        params[f"b_{layer}"] = b_ih + b_hh                     # b_ih + b_hh pre-summed

    # Linear(in_features = HIDDEN_SIZE + MAX_NUM_ARGS, out_features = 1)
    lin_scale = 1.0 / jnp.sqrt(jnp.float32(HIDDEN_SIZE + MAX_NUM_ARGS))
    w_lin = jax.random.uniform(
        ks[-2], (1, HIDDEN_SIZE + MAX_NUM_ARGS), jnp.float32, -1.0, 1.0) * lin_scale
    params["w_lin_h"] = w_lin[:, :HIDDEN_SIZE]
    params["w_lin_a"] = w_lin[:, HIDDEN_SIZE:]
    params["b_lin"] = jax.random.uniform(
        ks[-1], (1, 1), jnp.float32, -1.0, 1.0) * lin_scale
    return params


if __name__ == "__main__":
    key = jax.random.PRNGKey(0)
    k_param, k_tok = jax.random.split(key)

    params = init_params(k_param)
    token_ids = jax.random.randint(k_tok, (SEQ_LEN,), 0, VOCAB_SIZE, jnp.int32)
    trans_args = [2, 5]                   # 2-argument transformation, padded to 3
    args_vec = pad_args(trans_args)       # fixed (MAX_NUM_ARGS,) -> no retraces

    out = args_nn_forward(params, token_ids, args_vec)
    out = jax.block_until_ready(out)
    assert out.shape == (1,) and out.dtype == jnp.float32
    print("KERNEL_OK")
</pallas_src>

<mosaic_0001>
module attributes {stable_mosaic.version = 11 : i64} {
  func.func @_args_nn_kernel(%arg0: memref<8xi32, #tpu.memory_space<smem>>, %arg1: memref<40x32xf32, #tpu.memory_space<vmem>>, %arg2: memref<32x128xf32, #tpu.memory_space<vmem>>, %arg3: memref<32x128xf32, #tpu.memory_space<vmem>>, %arg4: memref<1x128xf32, #tpu.memory_space<vmem>>, %arg5: memref<32x128xf32, #tpu.memory_space<vmem>>, %arg6: memref<32x128xf32, #tpu.memory_space<vmem>>, %arg7: memref<1x128xf32, #tpu.memory_space<vmem>>, %arg8: memref<1x32xf32, #tpu.memory_space<vmem>>, %arg9: memref<1x3xf32, #tpu.memory_space<vmem>>, %arg10: memref<1x1xf32, #tpu.memory_space<vmem>>, %arg11: memref<1x3xf32, #tpu.memory_space<vmem>>, %arg12: memref<1x1xf32, #tpu.memory_space<vmem>>, %arg13: memref<8x32xf32, #tpu.memory_space<vmem>>, %arg14: memref<8x32xf32, #tpu.memory_space<vmem>>) attributes {dimension_semantics = [], scalar_prefetch = 0 : i64, scratch_operands = 2 : i64, tpu.core_type = #tpu.core_type<tc>} {
    %c0 = arith.constant 0 : index
    %0 = memref.load %arg0[%c0] : memref<8xi32, #tpu.memory_space<smem>>
    %1 = arith.index_cast %0 : i32 to index
    %c0_0 = arith.constant 0 : index
    %2 = vector.load %arg1[%1, %c0_0] : memref<40x32xf32, #tpu.memory_space<vmem>>, vector<1x32xf32>
    %c0_1 = arith.constant 0 : index
    %c0_2 = arith.constant 0 : index
    %3 = vector.load %arg13[%c0_1, %c0_2] : memref<8x32xf32, #tpu.memory_space<vmem>>, vector<1x32xf32>
    tpu.vector_store %arg13[%c0_1, %c0_2], %2 {strides = array<i32>} : memref<8x32xf32, #tpu.memory_space<vmem>>, vector<1x32xf32>,
    %c1 = arith.constant 1 : index
    %4 = memref.load %arg0[%c1] : memref<8xi32, #tpu.memory_space<smem>>
    %5 = arith.index_cast %4 : i32 to index
    %c0_3 = arith.constant 0 : index
    %6 = vector.load %arg1[%5, %c0_3] : memref<40x32xf32, #tpu.memory_space<vmem>>, vector<1x32xf32>
    %c1_4 = arith.constant 1 : index
    %c0_5 = arith.constant 0 : index
    %7 = vector.load %arg13[%c1_4, %c0_5] : memref<8x32xf32, #tpu.memory_space<vmem>>, vector<1x32xf32>
    tpu.vector_store %arg13[%c1_4, %c0_5], %6 {strides = array<i32>} : memref<8x32xf32, #tpu.memory_space<vmem>>, vector<1x32xf32>,
    %c2 = arith.constant 2 : index
    %8 = memref.load %arg0[%c2] : memref<8xi32, #tpu.memory_space<smem>>
    %9 = arith.index_cast %8 : i32 to index
    %c0_6 = arith.constant 0 : index
    %10 = vector.load %arg1[%9, %c0_6] : memref<40x32xf32, #tpu.memory_space<vmem>>, vector<1x32xf32>
    %c2_7 = arith.constant 2 : index
    %c0_8 = arith.constant 0 : index
    %11 = vector.load %arg13[%c2_7, %c0_8] : memref<8x32xf32, #tpu.memory_space<vmem>>, vector<1x32xf32>
    tpu.vector_store %arg13[%c2_7, %c0_8], %10 {strides = array<i32>} : memref<8x32xf32, #tpu.memory_space<vmem>>, vector<1x32xf32>,
    %c3 = arith.constant 3 : index
    %12 = memref.load %arg0[%c3] : memref<8xi32, #tpu.memory_space<smem>>
    %13 = arith.index_cast %12 : i32 to index
    %c0_9 = arith.constant 0 : index
    %14 = vector.load %arg1[%13, %c0_9] : memref<40x32xf32, #tpu.memory_space<vmem>>, vector<1x32xf32>
    %c3_10 = arith.constant 3 : index
    %c0_11 = arith.constant 0 : index
    %15 = vector.load %arg13[%c3_10, %c0_11] : memref<8x32xf32, #tpu.memory_space<vmem>>, vector<1x32xf32>
    tpu.vector_store %arg13[%c3_10, %c0_11], %14 {strides = array<i32>} : memref<8x32xf32, #tpu.memory_space<vmem>>, vector<1x32xf32>,
    %c4 = arith.constant 4 : index
    %16 = memref.load %arg0[%c4] : memref<8xi32, #tpu.memory_space<smem>>
    %17 = arith.index_cast %16 : i32 to index
    %c0_12 = arith.constant 0 : index
    %18 = vector.load %arg1[%17, %c0_12] : memref<40x32xf32, #tpu.memory_space<vmem>>, vector<1x32xf32>
    %c4_13 = arith.constant 4 : index
    %c0_14 = arith.constant 0 : index
    %19 = vector.load %arg13[%c4_13, %c0_14] : memref<8x32xf32, #tpu.memory_space<vmem>>, vector<1x32xf32>
    tpu.vector_store %arg13[%c4_13, %c0_14], %18 {strides = array<i32>} : memref<8x32xf32, #tpu.memory_space<vmem>>, vector<1x32xf32>,
    %c5 = arith.constant 5 : index
    %20 = memref.load %arg0[%c5] : memref<8xi32, #tpu.memory_space<smem>>
    %21 = arith.index_cast %20 : i32 to index
    %c0_15 = arith.constant 0 : index
    %22 = vector.load %arg1[%21, %c0_15] : memref<40x32xf32, #tpu.memory_space<vmem>>, vector<1x32xf32>
    %c5_16 = arith.constant 5 : index
    %c0_17 = arith.constant 0 : index
    %23 = vector.load %arg13[%c5_16, %c0_17] : memref<8x32xf32, #tpu.memory_space<vmem>>, vector<1x32xf32>
    tpu.vector_store %arg13[%c5_16, %c0_17], %22 {strides = array<i32>} : memref<8x32xf32, #tpu.memory_space<vmem>>, vector<1x32xf32>,
    %c6 = arith.constant 6 : index
    %24 = memref.load %arg0[%c6] : memref<8xi32, #tpu.memory_space<smem>>
    %25 = arith.index_cast %24 : i32 to index
    %c0_18 = arith.constant 0 : index
    %26 = vector.load %arg1[%25, %c0_18] : memref<40x32xf32, #tpu.memory_space<vmem>>, vector<1x32xf32>
    %c6_19 = arith.constant 6 : index
    %c0_20 = arith.constant 0 : index
    %27 = vector.load %arg13[%c6_19, %c0_20] : memref<8x32xf32, #tpu.memory_space<vmem>>, vector<1x32xf32>
    tpu.vector_store %arg13[%c6_19, %c0_20], %26 {strides = array<i32>} : memref<8x32xf32, #tpu.memory_space<vmem>>, vector<1x32xf32>,
    %c7 = arith.constant 7 : index
    %28 = memref.load %arg0[%c7] : memref<8xi32, #tpu.memory_space<smem>>
    %29 = arith.index_cast %28 : i32 to index
    %c0_21 = arith.constant 0 : index
    %30 = vector.load %arg1[%29, %c0_21] : memref<40x32xf32, #tpu.memory_space<vmem>>, vector<1x32xf32>
    %c7_22 = arith.constant 7 : index
    %c0_23 = arith.constant 0 : index
    %31 = vector.load %arg13[%c7_22, %c0_23] : memref<8x32xf32, #tpu.memory_space<vmem>>, vector<1x32xf32>
    tpu.vector_store %arg13[%c7_22, %c0_23], %30 {strides = array<i32>} : memref<8x32xf32, #tpu.memory_space<vmem>>, vector<1x32xf32>,
    %c0_24 = arith.constant 0 : index
    %c0_25 = arith.constant 0 : index
    %32 = vector.load %arg13[%c0_24, %c0_25] : memref<8x32xf32, #tpu.memory_space<vmem>>, vector<8x32xf32>
    %c0_26 = arith.constant 0 : index
    %c0_27 = arith.constant 0 : index
    %33 = vector.load %arg2[%c0_26, %c0_27] : memref<32x128xf32, #tpu.memory_space<vmem>>, vector<32x128xf32>
    %cst = arith.constant dense<0.000000e+00> : vector<8x128xf32>
    %34 = tpu.matmul %32, %33, %cst {dimension_numbers = #tpu.dot_dimension_numbers<[1], [0], [0], [1], [0, 0, 1, 1], [], []>} : vector<8x32xf32>, vector<32x128xf32>, vector<8x128xf32> -> vector<8x128xf32>
    %c0_28 = arith.constant 0 : index
    %c0_29 = arith.constant 0 : index
    %35 = vector.load %arg4[%c0_28, %c0_29] : memref<1x128xf32, #tpu.memory_space<vmem>>, vector<1x128xf32>
    %36 = vector.broadcast %35 : vector<1x128xf32> to vector<8x128xf32>
    %37 = arith.addf %34, %36 : vector<8x128xf32>
    %cst_30 = arith.constant 0.000000e+00 : f32
    %38 = vector.broadcast %cst_30 : f32 to vector<1x32xf32>
    %cst_31 = arith.constant 0.000000e+00 : f32
    %39 = vector.broadcast %cst_31 : f32 to vector<1x32xf32>
    %40 = vector.extract_strided_slice %37 {offsets = [0, 0], sizes = [1, 128], strides = [1, 1]} : vector<8x128xf32> to vector<1x128xf32>
    %c0_32 = arith.constant 0 : index
    %c0_33 = arith.constant 0 : index
    %41 = vector.load %arg3[%c0_32, %c0_33] : memref<32x128xf32, #tpu.memory_space<vmem>>, vector<32x128xf32>
    %cst_34 = arith.constant dense<0.000000e+00> : vector<1x128xf32>
    %42 = tpu.matmul %38, %41, %cst_34 {dimension_numbers = #tpu.dot_dimension_numbers<[1], [0], [0], [1], [0, 0, 1, 1], [], []>} : vector<1x32xf32>, vector<32x128xf32>, vector<1x128xf32> -> vector<1x128xf32>
    %43 = arith.addf %40, %42 : vector<1x128xf32>
    %44 = vector.extract_strided_slice %43 {offsets = [0, 0], sizes = [1, 32], strides = [1, 1]} : vector<1x128xf32> to vector<1x32xf32>
    %45 = arith.negf %44 : vector<1x32xf32>
    %46 = math.exp %45 : vector<1x32xf32>
    %cst_35 = arith.constant 1.000000e+00 : f32
    %47 = vector.broadcast %cst_35 : f32 to vector<1x32xf32>
    %48 = arith.addf %47, %46 : vector<1x32xf32>
    %49 = arith.divf %47, %48 : vector<1x32xf32>
    %50 = vector.extract_strided_slice %43 {offsets = [0, 32], sizes = [1, 32], strides = [1, 1]} : vector<1x128xf32> to vector<1x32xf32>
    %51 = arith.negf %50 : vector<1x32xf32>
    %52 = math.exp %51 : vector<1x32xf32>
    %cst_36 = arith.constant 1.000000e+00 : f32
    %53 = vector.broadcast %cst_36 : f32 to vector<1x32xf32>
    %54 = arith.addf %53, %52 : vector<1x32xf32>
    %55 = arith.divf %53, %54 : vector<1x32xf32>
    %56 = vector.extract_strided_slice %43 {offsets = [0, 64], sizes = [1, 32], strides = [1, 1]} : vector<1x128xf32> to vector<1x32xf32>
    %57 = math.tanh %56 : vector<1x32xf32>
    %58 = vector.extract_strided_slice %43 {offsets = [0, 96], sizes = [1, 32], strides = [1, 1]} : vector<1x128xf32> to vector<1x32xf32>
    %59 = arith.negf %58 : vector<1x32xf32>
    %60 = math.exp %59 : vector<1x32xf32>
    %cst_37 = arith.constant 1.000000e+00 : f32
    %61 = vector.broadcast %cst_37 : f32 to vector<1x32xf32>
    %62 = arith.addf %61, %60 : vector<1x32xf32>
    %63 = arith.divf %61, %62 : vector<1x32xf32>
    %64 = arith.mulf %55, %39 : vector<1x32xf32>
    %65 = arith.mulf %49, %57 : vector<1x32xf32>
    %66 = arith.addf %64, %65 : vector<1x32xf32>
    %67 = math.tanh %66 : vector<1x32xf32>
    %68 = arith.mulf %63, %67 : vector<1x32xf32>
    %c0_38 = arith.constant 0 : index
    %c0_39 = arith.constant 0 : index
    %69 = vector.load %arg14[%c0_38, %c0_39] : memref<8x32xf32, #tpu.memory_space<vmem>>, vector<1x32xf32>
    tpu.vector_store %arg14[%c0_38, %c0_39], %68 {strides = array<i32>} : memref<8x32xf32, #tpu.memory_space<vmem>>, vector<1x32xf32>,
    %70 = vector.extract_strided_slice %37 {offsets = [1, 0], sizes = [1, 128], strides = [1, 1]} : vector<8x128xf32> to vector<1x128xf32>
    %c0_40 = arith.constant 0 : index
    %c0_41 = arith.constant 0 : index
    %71 = vector.load %arg3[%c0_40, %c0_41] : memref<32x128xf32, #tpu.memory_space<vmem>>, vector<32x128xf32>
    %cst_42 = arith.constant dense<0.000000e+00> : vector<1x128xf32>
    %72 = tpu.matmul %68, %71, %cst_42 {dimension_numbers = #tpu.dot_dimension_numbers<[1], [0], [0], [1], [0, 0, 1, 1], [], []>} : vector<1x32xf32>, vector<32x128xf32>, vector<1x128xf32> -> vector<1x128xf32>
    %73 = arith.addf %70, %72 : vector<1x128xf32>
    %74 = vector.extract_strided_slice %73 {offsets = [0, 0], sizes = [1, 32], strides = [1, 1]} : vector<1x128xf32> to vector<1x32xf32>
    %75 = arith.negf %74 : vector<1x32xf32>
    %76 = math.exp %75 : vector<1x32xf32>
    %cst_43 = arith.constant 1.000000e+00 : f32
    %77 = vector.broadcast %cst_43 : f32 to vector<1x32xf32>
    %78 = arith.addf %77, %76 : vector<1x32xf32>
    %79 = arith.divf %77, %78 : vector<1x32xf32>
    %80 = vector.extract_strided_slice %73 {offsets = [0, 32], sizes = [1, 32], strides = [1, 1]} : vector<1x128xf32> to vector<1x32xf32>
    %81 = arith.negf %80 : vector<1x32xf32>
    %82 = math.exp %81 : vector<1x32xf32>
    %cst_44 = arith.constant 1.000000e+00 : f32
    %83 = vector.broadcast %cst_44 : f32 to vector<1x32xf32>
    %84 = arith.addf %83, %82 : vector<1x32xf32>
    %85 = arith.divf %83, %84 : vector<1x32xf32>
    %86 = vector.extract_strided_slice %73 {offsets = [0, 64], sizes = [1, 32], strides = [1, 1]} : vector<1x128xf32> to vector<1x32xf32>
    %87 = math.tanh %86 : vector<1x32xf32>
    %88 = vector.extract_strided_slice %73 {offsets = [0, 96], sizes = [1, 32], strides = [1, 1]} : vector<1x128xf32> to vector<1x32xf32>
    %89 = arith.negf %88 : vector<1x32xf32>
    %90 = math.exp %89 : vector<1x32xf32>
    %cst_45 = arith.constant 1.000000e+00 : f32
    %91 = vector.broadcast %cst_45 : f32 to vector<1x32xf32>
    %92 = arith.addf %91, %90 : vector<1x32xf32>
    %93 = arith.divf %91, %92 : vector<1x32xf32>
    %94 = arith.mulf %85, %66 : vector<1x32xf32>
    %95 = arith.mulf %79, %87 : vector<1x32xf32>
    %96 = arith.addf %94, %95 : vector<1x32xf32>
    %97 = math.tanh %96 : vector<1x32xf32>
    %98 = arith.mulf %93, %97 : vector<1x32xf32>
    %c1_46 = arith.constant 1 : index
    %c0_47 = arith.constant 0 : index
    %99 = vector.load %arg14[%c1_46, %c0_47] : memref<8x32xf32, #tpu.memory_space<vmem>>, vector<1x32xf32>
    tpu.vector_store %arg14[%c1_46, %c0_47], %98 {strides = array<i32>} : memref<8x32xf32, #tpu.memory_space<vmem>>, vector<1x32xf32>,
    %100 = vector.extract_strided_slice %37 {offsets = [2, 0], sizes = [1, 128], strides = [1, 1]} : vector<8x128xf32> to vector<1x128xf32>
    %c0_48 = arith.constant 0 : index
    %c0_49 = arith.constant 0 : index
    %101 = vector.load %arg3[%c0_48, %c0_49] : memref<32x128xf32, #tpu.memory_space<vmem>>, vector<32x128xf32>
    %cst_50 = arith.constant dense<0.000000e+00> : vector<1x128xf32>
    %102 = tpu.matmul %98, %101, %cst_50 {dimension_numbers = #tpu.dot_dimension_numbers<[1], [0], [0], [1], [0, 0, 1, 1], [], []>} : vector<1x32xf32>, vector<32x128xf32>, vector<1x128xf32> -> vector<1x128xf32>
    %103 = arith.addf %100, %102 : vector<1x128xf32>
    %104 = vector.extract_strided_slice %103 {offsets = [0, 0], sizes = [1, 32], strides = [1, 1]} : vector<1x128xf32> to vector<1x32xf32>
    %105 = arith.negf %104 : vector<1x32xf32>
    %106 = math.exp %105 : vector<1x32xf32>
    %cst_51 = arith.constant 1.000000e+00 : f32
    %107 = vector.broadcast %cst_51 : f32 to vector<1x32xf32>
    %108 = arith.addf %107, %106 : vector<1x32xf32>
    %109 = arith.divf %107, %108 : vector<1x32xf32>
    %110 = vector.extract_strided_slice %103 {offsets = [0, 32], sizes = [1, 32], strides = [1, 1]} : vector<1x128xf32> to vector<1x32xf32>
    %111 = arith.negf %110 : vector<1x32xf32>
    %112 = math.exp %111 : vector<1x32xf32>
    %cst_52 = arith.constant 1.000000e+00 : f32
    %113 = vector.broadcast %cst_52 : f32 to vector<1x32xf32>
    %114 = arith.addf %113, %112 : vector<1x32xf32>
    %115 = arith.divf %113, %114 : vector<1x32xf32>
    %116 = vector.extract_strided_slice %103 {offsets = [0, 64], sizes = [1, 32], strides = [1, 1]} : vector<1x128xf32> to vector<1x32xf32>
    %117 = math.tanh %116 : vector<1x32xf32>
    %118 = vector.extract_strided_slice %103 {offsets = [0, 96], sizes = [1, 32], strides = [1, 1]} : vector<1x128xf32> to vector<1x32xf32>
    %119 = arith.negf %118 : vector<1x32xf32>
    %120 = math.exp %119 : vector<1x32xf32>
    %cst_53 = arith.constant 1.000000e+00 : f32
    %121 = vector.broadcast %cst_53 : f32 to vector<1x32xf32>
    %122 = arith.addf %121, %120 : vector<1x32xf32>
    %123 = arith.divf %121, %122 : vector<1x32xf32>
    %124 = arith.mulf %115, %96 : vector<1x32xf32>
    %125 = arith.mulf %109, %117 : vector<1x32xf32>
    %126 = arith.addf %124, %125 : vector<1x32xf32>
    %127 = math.tanh %126 : vector<1x32xf32>
    %128 = arith.mulf %123, %127 : vector<1x32xf32>
    %c2_54 = arith.constant 2 : index
    %c0_55 = arith.constant 0 : index
    %129 = vector.load %arg14[%c2_54, %c0_55] : memref<8x32xf32, #tpu.memory_space<vmem>>, vector<1x32xf32>
    tpu.vector_store %arg14[%c2_54, %c0_55], %128 {strides = array<i32>} : memref<8x32xf32, #tpu.memory_space<vmem>>, vector<1x32xf32>,
    %130 = vector.extract_strided_slice %37 {offsets = [3, 0], sizes = [1, 128], strides = [1, 1]} : vector<8x128xf32> to vector<1x128xf32>
    %c0_56 = arith.constant 0 : index
    %c0_57 = arith.constant 0 : index
    %131 = vector.load %arg3[%c0_56, %c0_57] : memref<32x128xf32, #tpu.memory_space<vmem>>, vector<32x128xf32>
    %cst_58 = arith.constant dense<0.000000e+00> : vector<1x128xf32>
    %132 = tpu.matmul %128, %131, %cst_58 {dimension_numbers = #tpu.dot_dimension_numbers<[1], [0], [0], [1], [0, 0, 1, 1], [], []>} : vector<1x32xf32>, vector<32x128xf32>, vector<1x128xf32> -> vector<1x128xf32>
    %133 = arith.addf %130, %132 : vector<1x128xf32>
    %134 = vector.extract_strided_slice %133 {offsets = [0, 0], sizes = [1, 32], strides = [1, 1]} : vector<1x128xf32> to vector<1x32xf32>
    %135 = arith.negf %134 : vector<1x32xf32>
    %136 = math.exp %135 : vector<1x32xf32>
    %cst_59 = arith.constant 1.000000e+00 : f32
    %137 = vector.broadcast %cst_59 : f32 to vector<1x32xf32>
    %138 = arith.addf %137, %136 : vector<1x32xf32>
    %139 = arith.divf %137, %138 : vector<1x32xf32>
    %140 = vector.extract_strided_slice %133 {offsets = [0, 32], sizes = [1, 32], strides = [1, 1]} : vector<1x128xf32> to vector<1x32xf32>
    %141 = arith.negf %140 : vector<1x32xf32>
    %142 = math.exp %141 : vector<1x32xf32>
    %cst_60 = arith.constant 1.000000e+00 : f32
    %143 = vector.broadcast %cst_60 : f32 to vector<1x32xf32>
    %144 = arith.addf %143, %142 : vector<1x32xf32>
    %145 = arith.divf %143, %144 : vector<1x32xf32>
    %146 = vector.extract_strided_slice %133 {offsets = [0, 64], sizes = [1, 32], strides = [1, 1]} : vector<1x128xf32> to vector<1x32xf32>
    %147 = math.tanh %146 : vector<1x32xf32>
    %148 = vector.extract_strided_slice %133 {offsets = [0, 96], sizes = [1, 32], strides = [1, 1]} : vector<1x128xf32> to vector<1x32xf32>
    %149 = arith.negf %148 : vector<1x32xf32>
    %150 = math.exp %149 : vector<1x32xf32>
    %cst_61 = arith.constant 1.000000e+00 : f32
    %151 = vector.broadcast %cst_61 : f32 to vector<1x32xf32>
    %152 = arith.addf %151, %150 : vector<1x32xf32>
    %153 = arith.divf %151, %152 : vector<1x32xf32>
    %154 = arith.mulf %145, %126 : vector<1x32xf32>
    %155 = arith.mulf %139, %147 : vector<1x32xf32>
    %156 = arith.addf %154, %155 : vector<1x32xf32>
    %157 = math.tanh %156 : vector<1x32xf32>
    %158 = arith.mulf %153, %157 : vector<1x32xf32>
    %c3_62 = arith.constant 3 : index
    %c0_63 = arith.constant 0 : index
    %159 = vector.load %arg14[%c3_62, %c0_63] : memref<8x32xf32, #tpu.memory_space<vmem>>, vector<1x32xf32>
    tpu.vector_store %arg14[%c3_62, %c0_63], %158 {strides = array<i32>} : memref<8x32xf32, #tpu.memory_space<vmem>>, vector<1x32xf32>,
    %160 = vector.extract_strided_slice %37 {offsets = [4, 0], sizes = [1, 128], strides = [1, 1]} : vector<8x128xf32> to vector<1x128xf32>
    %c0_64 = arith.constant 0 : index
    %c0_65 = arith.constant 0 : index
    %161 = vector.load %arg3[%c0_64, %c0_65] : memref<32x128xf32, #tpu.memory_space<vmem>>, vector<32x128xf32>
    %cst_66 = arith.constant dense<0.000000e+00> : vector<1x128xf32>
    %162 = tpu.matmul %158, %161, %cst_66 {dimension_numbers = #tpu.dot_dimension_numbers<[1], [0], [0], [1], [0, 0, 1, 1], [], []>} : vector<1x32xf32>, vector<32x128xf32>, vector<1x128xf32> -> vector<1x128xf32>
    %163 = arith.addf %160, %162 : vector<1x128xf32>
    %164 = vector.extract_strided_slice %163 {offsets = [0, 0], sizes = [1, 32], strides = [1, 1]} : vector<1x128xf32> to vector<1x32xf32>
    %165 = arith.negf %164 : vector<1x32xf32>
    %166 = math.exp %165 : vector<1x32xf32>
    %cst_67 = arith.constant 1.000000e+00 : f32
    %167 = vector.broadcast %cst_67 : f32 to vector<1x32xf32>
    %168 = arith.addf %167, %166 : vector<1x32xf32>
    %169 = arith.divf %167, %168 : vector<1x32xf32>
    %170 = vector.extract_strided_slice %163 {offsets = [0, 32], sizes = [1, 32], strides = [1, 1]} : vector<1x128xf32> to vector<1x32xf32>
    %171 = arith.negf %170 : vector<1x32xf32>
    %172 = math.exp %171 : vector<1x32xf32>
    %cst_68 = arith.constant 1.000000e+00 : f32
    %173 = vector.broadcast %cst_68 : f32 to vector<1x32xf32>
    %174 = arith.addf %173, %172 : vector<1x32xf32>
    %175 = arith.divf %173, %174 : vector<1x32xf32>
    %176 = vector.extract_strided_slice %163 {offsets = [0, 64], sizes = [1, 32], strides = [1, 1]} : vector<1x128xf32> to vector<1x32xf32>
    %177 = math.tanh %176 : vector<1x32xf32>
    %178 = vector.extract_strided_slice %163 {offsets = [0, 96], sizes = [1, 32], strides = [1, 1]} : vector<1x128xf32> to vector<1x32xf32>
    %179 = arith.negf %178 : vector<1x32xf32>
    %180 = math.exp %179 : vector<1x32xf32>
    %cst_69 = arith.constant 1.000000e+00 : f32
    %181 = vector.broadcast %cst_69 : f32 to vector<1x32xf32>
    %182 = arith.addf %181, %180 : vector<1x32xf32>
    %183 = arith.divf %181, %182 : vector<1x32xf32>
    %184 = arith.mulf %175, %156 : vector<1x32xf32>
    %185 = arith.mulf %169, %177 : vector<1x32xf32>
    %186 = arith.addf %184, %185 : vector<1x32xf32>
    %187 = math.tanh %186 : vector<1x32xf32>
    %188 = arith.mulf %183, %187 : vector<1x32xf32>
    %c4_70 = arith.constant 4 : index
    %c0_71 = arith.constant 0 : index
    %189 = vector.load %arg14[%c4_70, %c0_71] : memref<8x32xf32, #tpu.memory_space<vmem>>, vector<1x32xf32>
    tpu.vector_store %arg14[%c4_70, %c0_71], %188 {strides = array<i32>} : memref<8x32xf32, #tpu.memory_space<vmem>>, vector<1x32xf32>,
    %190 = vector.extract_strided_slice %37 {offsets = [5, 0], sizes = [1, 128], strides = [1, 1]} : vector<8x128xf32> to vector<1x128xf32>
    %c0_72 = arith.constant 0 : index
    %c0_73 = arith.constant 0 : index
    %191 = vector.load %arg3[%c0_72, %c0_73] : memref<32x128xf32, #tpu.memory_space<vmem>>, vector<32x128xf32>
    %cst_74 = arith.constant dense<0.000000e+00> : vector<1x128xf32>
    %192 = tpu.matmul %188, %191, %cst_74 {dimension_numbers = #tpu.dot_dimension_numbers<[1], [0], [0], [1], [0, 0, 1, 1], [], []>} : vector<1x32xf32>, vector<32x128xf32>, vector<1x128xf32> -> vector<1x128xf32>
    %193 = arith.addf %190, %192 : vector<1x128xf32>
    %194 = vector.extract_strided_slice %193 {offsets = [0, 0], sizes = [1, 32], strides = [1, 1]} : vector<1x128xf32> to vector<1x32xf32>
    %195 = arith.negf %194 : vector<1x32xf32>
    %196 = math.exp %195 : vector<1x32xf32>
    %cst_75 = arith.constant 1.000000e+00 : f32
    %197 = vector.broadcast %cst_75 : f32 to vector<1x32xf32>
    %198 = arith.addf %197, %196 : vector<1x32xf32>
    %199 = arith.divf %197, %198 : vector<1x32xf32>
    %200 = vector.extract_strided_slice %193 {offsets = [0, 32], sizes = [1, 32], strides = [1, 1]} : vector<1x128xf32> to vector<1x32xf32>
    %201 = arith.negf %200 : vector<1x32xf32>
    %202 = math.exp %201 : vector<1x32xf32>
    %cst_76 = arith.constant 1.000000e+00 : f32
    %203 = vector.broadcast %cst_76 : f32 to vector<1x32xf32>
    %204 = arith.addf %203, %202 : vector<1x32xf32>
    %205 = arith.divf %203, %204 : vector<1x32xf32>
    %206 = vector.extract_strided_slice %193 {offsets = [0, 64], sizes = [1, 32], strides = [1, 1]} : vector<1x128xf32> to vector<1x32xf32>
    %207 = math.tanh %206 : vector<1x32xf32>
    %208 = vector.extract_strided_slice %193 {offsets = [0, 96], sizes = [1, 32], strides = [1, 1]} : vector<1x128xf32> to vector<1x32xf32>
    %209 = arith.negf %208 : vector<1x32xf32>
    %210 = math.exp %209 : vector<1x32xf32>
    %cst_77 = arith.constant 1.000000e+00 : f32
    %211 = vector.broadcast %cst_77 : f32 to vector<1x32xf32>
    %212 = arith.addf %211, %210 : vector<1x32xf32>
    %213 = arith.divf %211, %212 : vector<1x32xf32>
    %214 = arith.mulf %205, %186 : vector<1x32xf32>
    %215 = arith.mulf %199, %207 : vector<1x32xf32>
    %216 = arith.addf %214, %215 : vector<1x32xf32>
    %217 = math.tanh %216 : vector<1x32xf32>
    %218 = arith.mulf %213, %217 : vector<1x32xf32>
    %c5_78 = arith.constant 5 : index
    %c0_79 = arith.constant 0 : index
    %219 = vector.load %arg14[%c5_78, %c0_79] : memref<8x32xf32, #tpu.memory_space<vmem>>, vector<1x32xf32>
    tpu.vector_store %arg14[%c5_78, %c0_79], %218 {strides = array<i32>} : memref<8x32xf32, #tpu.memory_space<vmem>>, vector<1x32xf32>,
    %220 = vector.extract_strided_slice %37 {offsets = [6, 0], sizes = [1, 128], strides = [1, 1]} : vector<8x128xf32> to vector<1x128xf32>
    %c0_80 = arith.constant 0 : index
    %c0_81 = arith.constant 0 : index
    %221 = vector.load %arg3[%c0_80, %c0_81] : memref<32x128xf32, #tpu.memory_space<vmem>>, vector<32x128xf32>
    %cst_82 = arith.constant dense<0.000000e+00> : vector<1x128xf32>
    %222 = tpu.matmul %218, %221, %cst_82 {dimension_numbers = #tpu.dot_dimension_numbers<[1], [0], [0], [1], [0, 0, 1, 1], [], []>} : vector<1x32xf32>, vector<32x128xf32>, vector<1x128xf32> -> vector<1x128xf32>
    %223 = arith.addf %220, %222 : vector<1x128xf32>
    %224 = vector.extract_strided_slice %223 {offsets = [0, 0], sizes = [1, 32], strides = [1, 1]} : vector<1x128xf32> to vector<1x32xf32>
    %225 = arith.negf %224 : vector<1x32xf32>
    %226 = math.exp %225 : vector<1x32xf32>
    %cst_83 = arith.constant 1.000000e+00 : f32
    %227 = vector.broadcast %cst_83 : f32 to vector<1x32xf32>
    %228 = arith.addf %227, %226 : vector<1x32xf32>
    %229 = arith.divf %227, %228 : vector<1x32xf32>
    %230 = vector.extract_strided_slice %223 {offsets = [0, 32], sizes = [1, 32], strides = [1, 1]} : vector<1x128xf32> to vector<1x32xf32>
    %231 = arith.negf %230 : vector<1x32xf32>
    %232 = math.exp %231 : vector<1x32xf32>
    %cst_84 = arith.constant 1.000000e+00 : f32
    %233 = vector.broadcast %cst_84 : f32 to vector<1x32xf32>
    %234 = arith.addf %233, %232 : vector<1x32xf32>
    %235 = arith.divf %233, %234 : vector<1x32xf32>
    %236 = vector.extract_strided_slice %223 {offsets = [0, 64], sizes = [1, 32], strides = [1, 1]} : vector<1x128xf32> to vector<1x32xf32>
    %237 = math.tanh %236 : vector<1x32xf32>
    %238 = vector.extract_strided_slice %223 {offsets = [0, 96], sizes = [1, 32], strides = [1, 1]} : vector<1x128xf32> to vector<1x32xf32>
    %239 = arith.negf %238 : vector<1x32xf32>
    %240 = math.exp %239 : vector<1x32xf32>
    %cst_85 = arith.constant 1.000000e+00 : f32
    %241 = vector.broadcast %cst_85 : f32 to vector<1x32xf32>
    %242 = arith.addf %241, %240 : vector<1x32xf32>
    %243 = arith.divf %241, %242 : vector<1x32xf32>
    %244 = arith.mulf %235, %216 : vector<1x32xf32>
    %245 = arith.mulf %229, %237 : vector<1x32xf32>
    %246 = arith.addf %244, %245 : vector<1x32xf32>
    %247 = math.tanh %246 : vector<1x32xf32>
    %248 = arith.mulf %243, %247 : vector<1x32xf32>
    %c6_86 = arith.constant 6 : index
    %c0_87 = arith.constant 0 : index
    %249 = vector.load %arg14[%c6_86, %c0_87] : memref<8x32xf32, #tpu.memory_space<vmem>>, vector<1x32xf32>
    tpu.vector_store %arg14[%c6_86, %c0_87], %248 {strides = array<i32>} : memref<8x32xf32, #tpu.memory_space<vmem>>, vector<1x32xf32>,
    %250 = vector.extract_strided_slice %37 {offsets = [7, 0], sizes = [1, 128], strides = [1, 1]} : vector<8x128xf32> to vector<1x128xf32>
    %c0_88 = arith.constant 0 : index
    %c0_89 = arith.constant 0 : index
    %251 = vector.load %arg3[%c0_88, %c0_89] : memref<32x128xf32, #tpu.memory_space<vmem>>, vector<32x128xf32>
    %cst_90 = arith.constant dense<0.000000e+00> : vector<1x128xf32>
    %252 = tpu.matmul %248, %251, %cst_90 {dimension_numbers = #tpu.dot_dimension_numbers<[1], [0], [0], [1], [0, 0, 1, 1], [], []>} : vector<1x32xf32>, vector<32x128xf32>, vector<1x128xf32> -> vector<1x128xf32>
    %253 = arith.addf %250, %252 : vector<1x128xf32>
    %254 = vector.extract_strided_slice %253 {offsets = [0, 0], sizes = [1, 32], strides = [1, 1]} : vector<1x128xf32> to vector<1x32xf32>
    %255 = arith.negf %254 : vector<1x32xf32>
    %256 = math.exp %255 : vector<1x32xf32>
    %cst_91 = arith.constant 1.000000e+00 : f32
    %257 = vector.broadcast %cst_91 : f32 to vector<1x32xf32>
    %258 = arith.addf %257, %256 : vector<1x32xf32>
    %259 = arith.divf %257, %258 : vector<1x32xf32>
    %260 = vector.extract_strided_slice %253 {offsets = [0, 32], sizes = [1, 32], strides = [1, 1]} : vector<1x128xf32> to vector<1x32xf32>
    %261 = arith.negf %260 : vector<1x32xf32>
    %262 = math.exp %261 : vector<1x32xf32>
    %cst_92 = arith.constant 1.000000e+00 : f32
    %263 = vector.broadcast %cst_92 : f32 to vector<1x32xf32>
    %264 = arith.addf %263, %262 : vector<1x32xf32>
    %265 = arith.divf %263, %264 : vector<1x32xf32>
    %266 = vector.extract_strided_slice %253 {offsets = [0, 64], sizes = [1, 32], strides = [1, 1]} : vector<1x128xf32> to vector<1x32xf32>
    %267 = math.tanh %266 : vector<1x32xf32>
    %268 = vector.extract_strided_slice %253 {offsets = [0, 96], sizes = [1, 32], strides = [1, 1]} : vector<1x128xf32> to vector<1x32xf32>
    %269 = arith.negf %268 : vector<1x32xf32>
    %270 = math.exp %269 : vector<1x32xf32>
    %cst_93 = arith.constant 1.000000e+00 : f32
    %271 = vector.broadcast %cst_93 : f32 to vector<1x32xf32>
    %272 = arith.addf %271, %270 : vector<1x32xf32>
    %273 = arith.divf %271, %272 : vector<1x32xf32>
    %274 = arith.mulf %265, %246 : vector<1x32xf32>
    %275 = arith.mulf %259, %267 : vector<1x32xf32>
    %276 = arith.addf %274, %275 : vector<1x32xf32>
    %277 = math.tanh %276 : vector<1x32xf32>
    %278 = arith.mulf %273, %277 : vector<1x32xf32>
    %c7_94 = arith.constant 7 : index
    %c0_95 = arith.constant 0 : index
    %279 = vector.load %arg14[%c7_94, %c0_95] : memref<8x32xf32, #tpu.memory_space<vmem>>, vector<1x32xf32>
    tpu.vector_store %arg14[%c7_94, %c0_95], %278 {strides = array<i32>} : memref<8x32xf32, #tpu.memory_space<vmem>>, vector<1x32xf32>,
    %c0_96 = arith.constant 0 : index
    %c0_97 = arith.constant 0 : index
    %280 = vector.load %arg14[%c0_96, %c0_97] : memref<8x32xf32, #tpu.memory_space<vmem>>, vector<8x32xf32>
    %c0_98 = arith.constant 0 : index
    %c0_99 = arith.constant 0 : index
    %281 = vector.load %arg5[%c0_98, %c0_99] : memref<32x128xf32, #tpu.memory_space<vmem>>, vector<32x128xf32>
    %cst_100 = arith.constant dense<0.000000e+00> : vector<8x128xf32>
    %282 = tpu.matmul %280, %281, %cst_100 {dimension_numbers = #tpu.dot_dimension_numbers<[1], [0], [0], [1], [0, 0, 1, 1], [], []>} : vector<8x32xf32>, vector<32x128xf32>, vector<8x128xf32> -> vector<8x128xf32>
    %c0_101 = arith.constant 0 : index
    %c0_102 = arith.constant 0 : index
    %283 = vector.load %arg7[%c0_101, %c0_102] : memref<1x128xf32, #tpu.memory_space<vmem>>, vector<1x128xf32>
    %284 = vector.broadcast %283 : vector<1x128xf32> to vector<8x128xf32>
    %285 = arith.addf %282, %284 : vector<8x128xf32>
    %cst_103 = arith.constant 0.000000e+00 : f32
    %286 = vector.broadcast %cst_103 : f32 to vector<1x32xf32>
    %cst_104 = arith.constant 0.000000e+00 : f32
    %287 = vector.broadcast %cst_104 : f32 to vector<1x32xf32>
    %288 = vector.extract_strided_slice %285 {offsets = [0, 0], sizes = [1, 128], strides = [1, 1]} : vector<8x128xf32> to vector<1x128xf32>
    %c0_105 = arith.constant 0 : index
    %c0_106 = arith.constant 0 : index
    %289 = vector.load %arg6[%c0_105, %c0_106] : memref<32x128xf32, #tpu.memory_space<vmem>>, vector<32x128xf32>
    %cst_107 = arith.constant dense<0.000000e+00> : vector<1x128xf32>
    %290 = tpu.matmul %286, %289, %cst_107 {dimension_numbers = #tpu.dot_dimension_numbers<[1], [0], [0], [1], [0, 0, 1, 1], [], []>} : vector<1x32xf32>, vector<32x128xf32>, vector<1x128xf32> -> vector<1x128xf32>
    %291 = arith.addf %288, %290 : vector<1x128xf32>
    %292 = vector.extract_strided_slice %291 {offsets = [0, 0], sizes = [1, 32], strides = [1, 1]} : vector<1x128xf32> to vector<1x32xf32>
    %293 = arith.negf %292 : vector<1x32xf32>
    %294 = math.exp %293 : vector<1x32xf32>
    %cst_108 = arith.constant 1.000000e+00 : f32
    %295 = vector.broadcast %cst_108 : f32 to vector<1x32xf32>
    %296 = arith.addf %295, %294 : vector<1x32xf32>
    %297 = arith.divf %295, %296 : vector<1x32xf32>
    %298 = vector.extract_strided_slice %291 {offsets = [0, 32], sizes = [1, 32], strides = [1, 1]} : vector<1x128xf32> to vector<1x32xf32>
    %299 = arith.negf %298 : vector<1x32xf32>
    %300 = math.exp %299 : vector<1x32xf32>
    %cst_109 = arith.constant 1.000000e+00 : f32
    %301 = vector.broadcast %cst_109 : f32 to vector<1x32xf32>
    %302 = arith.addf %301, %300 : vector<1x32xf32>
    %303 = arith.divf %301, %302 : vector<1x32xf32>
    %304 = vector.extract_strided_slice %291 {offsets = [0, 64], sizes = [1, 32], strides = [1, 1]} : vector<1x128xf32> to vector<1x32xf32>
    %305 = math.tanh %304 : vector<1x32xf32>
    %306 = vector.extract_strided_slice %291 {offsets = [0, 96], sizes = [1, 32], strides = [1, 1]} : vector<1x128xf32> to vector<1x32xf32>
    %307 = arith.negf %306 : vector<1x32xf32>
    %308 = math.exp %307 : vector<1x32xf32>
    %cst_110 = arith.constant 1.000000e+00 : f32
    %309 = vector.broadcast %cst_110 : f32 to vector<1x32xf32>
    %310 = arith.addf %309, %308 : vector<1x32xf32>
    %311 = arith.divf %309, %310 : vector<1x32xf32>
    %312 = arith.mulf %303, %287 : vector<1x32xf32>
    %313 = arith.mulf %297, %305 : vector<1x32xf32>
    %314 = arith.addf %312, %313 : vector<1x32xf32>
    %315 = math.tanh %314 : vector<1x32xf32>
    %316 = arith.mulf %311, %315 : vector<1x32xf32>
    %317 = vector.extract_strided_slice %285 {offsets = [1, 0], sizes = [1, 128], strides = [1, 1]} : vector<8x128xf32> to vector<1x128xf32>
    %c0_111 = arith.constant 0 : index
    %c0_112 = arith.constant 0 : index
    %318 = vector.load %arg6[%c0_111, %c0_112] : memref<32x128xf32, #tpu.memory_space<vmem>>, vector<32x128xf32>
    %cst_113 = arith.constant dense<0.000000e+00> : vector<1x128xf32>
    %319 = tpu.matmul %316, %318, %cst_113 {dimension_numbers = #tpu.dot_dimension_numbers<[1], [0], [0], [1], [0, 0, 1, 1], [], []>} : vector<1x32xf32>, vector<32x128xf32>, vector<1x128xf32> -> vector<1x128xf32>
    %320 = arith.addf %317, %319 : vector<1x128xf32>
    %321 = vector.extract_strided_slice %320 {offsets = [0, 0], sizes = [1, 32], strides = [1, 1]} : vector<1x128xf32> to vector<1x32xf32>
    %322 = arith.negf %321 : vector<1x32xf32>
    %323 = math.exp %322 : vector<1x32xf32>
    %cst_114 = arith.constant 1.000000e+00 : f32
    %324 = vector.broadcast %cst_114 : f32 to vector<1x32xf32>
    %325 = arith.addf %324, %323 : vector<1x32xf32>
    %326 = arith.divf %324, %325 : vector<1x32xf32>
    %327 = vector.extract_strided_slice %320 {offsets = [0, 32], sizes = [1, 32], strides = [1, 1]} : vector<1x128xf32> to vector<1x32xf32>
    %328 = arith.negf %327 : vector<1x32xf32>
    %329 = math.exp %328 : vector<1x32xf32>
    %cst_115 = arith.constant 1.000000e+00 : f32
    %330 = vector.broadcast %cst_115 : f32 to vector<1x32xf32>
    %331 = arith.addf %330, %329 : vector<1x32xf32>
    %332 = arith.divf %330, %331 : vector<1x32xf32>
    %333 = vector.extract_strided_slice %320 {offsets = [0, 64], sizes = [1, 32], strides = [1, 1]} : vector<1x128xf32> to vector<1x32xf32>
    %334 = math.tanh %333 : vector<1x32xf32>
    %335 = vector.extract_strided_slice %320 {offsets = [0, 96], sizes = [1, 32], strides = [1, 1]} : vector<1x128xf32> to vector<1x32xf32>
    %336 = arith.negf %335 : vector<1x32xf32>
    %337 = math.exp %336 : vector<1x32xf32>
    %cst_116 = arith.constant 1.000000e+00 : f32
    %338 = vector.broadcast %cst_116 : f32 to vector<1x32xf32>
    %339 = arith.addf %338, %337 : vector<1x32xf32>
    %340 = arith.divf %338, %339 : vector<1x32xf32>
    %341 = arith.mulf %332, %314 : vector<1x32xf32>
    %342 = arith.mulf %326, %334 : vector<1x32xf32>
    %343 = arith.addf %341, %342 : vector<1x32xf32>
    %344 = math.tanh %343 : vector<1x32xf32>
    %345 = arith.mulf %340, %344 : vector<1x32xf32>
    %346 = vector.extract_strided_slice %285 {offsets = [2, 0], sizes = [1, 128], strides = [1, 1]} : vector<8x128xf32> to vector<1x128xf32>
    %c0_117 = arith.constant 0 : index
    %c0_118 = arith.constant 0 : index
    %347 = vector.load %arg6[%c0_117, %c0_118] : memref<32x128xf32, #tpu.memory_space<vmem>>, vector<32x128xf32>
    %cst_119 = arith.constant dense<0.000000e+00> : vector<1x128xf32>
    %348 = tpu.matmul %345, %347, %cst_119 {dimension_numbers = #tpu.dot_dimension_numbers<[1], [0], [0], [1], [0, 0, 1, 1], [], []>} : vector<1x32xf32>, vector<32x128xf32>, vector<1x128xf32> -> vector<1x128xf32>
    %349 = arith.addf %346, %348 : vector<1x128xf32>
    %350 = vector.extract_strided_slice %349 {offsets = [0, 0], sizes = [1, 32], strides = [1, 1]} : vector<1x128xf32> to vector<1x32xf32>
    %351 = arith.negf %350 : vector<1x32xf32>
    %352 = math.exp %351 : vector<1x32xf32>
    %cst_120 = arith.constant 1.000000e+00 : f32
    %353 = vector.broadcast %cst_120 : f32 to vector<1x32xf32>
    %354 = arith.addf %353, %352 : vector<1x32xf32>
    %355 = arith.divf %353, %354 : vector<1x32xf32>
    %356 = vector.extract_strided_slice %349 {offsets = [0, 32], sizes = [1, 32], strides = [1, 1]} : vector<1x128xf32> to vector<1x32xf32>
    %357 = arith.negf %356 : vector<1x32xf32>
    %358 = math.exp %357 : vector<1x32xf32>
    %cst_121 = arith.constant 1.000000e+00 : f32
    %359 = vector.broadcast %cst_121 : f32 to vector<1x32xf32>
    %360 = arith.addf %359, %358 : vector<1x32xf32>
    %361 = arith.divf %359, %360 : vector<1x32xf32>
    %362 = vector.extract_strided_slice %349 {offsets = [0, 64], sizes = [1, 32], strides = [1, 1]} : vector<1x128xf32> to vector<1x32xf32>
    %363 = math.tanh %362 : vector<1x32xf32>
    %364 = vector.extract_strided_slice %349 {offsets = [0, 96], sizes = [1, 32], strides = [1, 1]} : vector<1x128xf32> to vector<1x32xf32>
    %365 = arith.negf %364 : vector<1x32xf32>
    %366 = math.exp %365 : vector<1x32xf32>
    %cst_122 = arith.constant 1.000000e+00 : f32
    %367 = vector.broadcast %cst_122 : f32 to vector<1x32xf32>
    %368 = arith.addf %367, %366 : vector<1x32xf32>
    %369 = arith.divf %367, %368 : vector<1x32xf32>
    %370 = arith.mulf %361, %343 : vector<1x32xf32>
    %371 = arith.mulf %355, %363 : vector<1x32xf32>
    %372 = arith.addf %370, %371 : vector<1x32xf32>
    %373 = math.tanh %372 : vector<1x32xf32>
    %374 = arith.mulf %369, %373 : vector<1x32xf32>
    %375 = vector.extract_strided_slice %285 {offsets = [3, 0], sizes = [1, 128], strides = [1, 1]} : vector<8x128xf32> to vector<1x128xf32>
    %c0_123 = arith.constant 0 : index
    %c0_124 = arith.constant 0 : index
    %376 = vector.load %arg6[%c0_123, %c0_124] : memref<32x128xf32, #tpu.memory_space<vmem>>, vector<32x128xf32>
    %cst_125 = arith.constant dense<0.000000e+00> : vector<1x128xf32>
    %377 = tpu.matmul %374, %376, %cst_125 {dimension_numbers = #tpu.dot_dimension_numbers<[1], [0], [0], [1], [0, 0, 1, 1], [], []>} : vector<1x32xf32>, vector<32x128xf32>, vector<1x128xf32> -> vector<1x128xf32>
    %378 = arith.addf %375, %377 : vector<1x128xf32>
    %379 = vector.extract_strided_slice %378 {offsets = [0, 0], sizes = [1, 32], strides = [1, 1]} : vector<1x128xf32> to vector<1x32xf32>
    %380 = arith.negf %379 : vector<1x32xf32>
    %381 = math.exp %380 : vector<1x32xf32>
    %cst_126 = arith.constant 1.000000e+00 : f32
    %382 = vector.broadcast %cst_126 : f32 to vector<1x32xf32>
    %383 = arith.addf %382, %381 : vector<1x32xf32>
    %384 = arith.divf %382, %383 : vector<1x32xf32>
    %385 = vector.extract_strided_slice %378 {offsets = [0, 32], sizes = [1, 32], strides = [1, 1]} : vector<1x128xf32> to vector<1x32xf32>
    %386 = arith.negf %385 : vector<1x32xf32>
    %387 = math.exp %386 : vector<1x32xf32>
    %cst_127 = arith.constant 1.000000e+00 : f32
    %388 = vector.broadcast %cst_127 : f32 to vector<1x32xf32>
    %389 = arith.addf %388, %387 : vector<1x32xf32>
    %390 = arith.divf %388, %389 : vector<1x32xf32>
    %391 = vector.extract_strided_slice %378 {offsets = [0, 64], sizes = [1, 32], strides = [1, 1]} : vector<1x128xf32> to vector<1x32xf32>
    %392 = math.tanh %391 : vector<1x32xf32>
    %393 = vector.extract_strided_slice %378 {offsets = [0, 96], sizes = [1, 32], strides = [1, 1]} : vector<1x128xf32> to vector<1x32xf32>
    %394 = arith.negf %393 : vector<1x32xf32>
    %395 = math.exp %394 : vector<1x32xf32>
    %cst_128 = arith.constant 1.000000e+00 : f32
    %396 = vector.broadcast %cst_128 : f32 to vector<1x32xf32>
    %397 = arith.addf %396, %395 : vector<1x32xf32>
    %398 = arith.divf %396, %397 : vector<1x32xf32>
    %399 = arith.mulf %390, %372 : vector<1x32xf32>
    %400 = arith.mulf %384, %392 : vector<1x32xf32>
    %401 = arith.addf %399, %400 : vector<1x32xf32>
    %402 = math.tanh %401 : vector<1x32xf32>
    %403 = arith.mulf %398, %402 : vector<1x32xf32>
    %404 = vector.extract_strided_slice %285 {offsets = [4, 0], sizes = [1, 128], strides = [1, 1]} : vector<8x128xf32> to vector<1x128xf32>
    %c0_129 = arith.constant 0 : index
    %c0_130 = arith.constant 0 : index
    %405 = vector.load %arg6[%c0_129, %c0_130] : memref<32x128xf32, #tpu.memory_space<vmem>>, vector<32x128xf32>
    %cst_131 = arith.constant dense<0.000000e+00> : vector<1x128xf32>
    %406 = tpu.matmul %403, %405, %cst_131 {dimension_numbers = #tpu.dot_dimension_numbers<[1], [0], [0], [1], [0, 0, 1, 1], [], []>} : vector<1x32xf32>, vector<32x128xf32>, vector<1x128xf32> -> vector<1x128xf32>
    %407 = arith.addf %404, %406 : vector<1x128xf32>
    %408 = vector.extract_strided_slice %407 {offsets = [0, 0], sizes = [1, 32], strides = [1, 1]} : vector<1x128xf32> to vector<1x32xf32>
    %409 = arith.negf %408 : vector<1x32xf32>
    %410 = math.exp %409 : vector<1x32xf32>
    %cst_132 = arith.constant 1.000000e+00 : f32
    %411 = vector.broadcast %cst_132 : f32 to vector<1x32xf32>
    %412 = arith.addf %411, %410 : vector<1x32xf32>
    %413 = arith.divf %411, %412 : vector<1x32xf32>
    %414 = vector.extract_strided_slice %407 {offsets = [0, 32], sizes = [1, 32], strides = [1, 1]} : vector<1x128xf32> to vector<1x32xf32>
    %415 = arith.negf %414 : vector<1x32xf32>
    %416 = math.exp %415 : vector<1x32xf32>
    %cst_133 = arith.constant 1.000000e+00 : f32
    %417 = vector.broadcast %cst_133 : f32 to vector<1x32xf32>
    %418 = arith.addf %417, %416 : vector<1x32xf32>
    %419 = arith.divf %417, %418 : vector<1x32xf32>
    %420 = vector.extract_strided_slice %407 {offsets = [0, 64], sizes = [1, 32], strides = [1, 1]} : vector<1x128xf32> to vector<1x32xf32>
    %421 = math.tanh %420 : vector<1x32xf32>
    %422 = vector.extract_strided_slice %407 {offsets = [0, 96], sizes = [1, 32], strides = [1, 1]} : vector<1x128xf32> to vector<1x32xf32>
    %423 = arith.negf %422 : vector<1x32xf32>
    %424 = math.exp %423 : vector<1x32xf32>
    %cst_134 = arith.constant 1.000000e+00 : f32
    %425 = vector.broadcast %cst_134 : f32 to vector<1x32xf32>
    %426 = arith.addf %425, %424 : vector<1x32xf32>
    %427 = arith.divf %425, %426 : vector<1x32xf32>
    %428 = arith.mulf %419, %401 : vector<1x32xf32>
    %429 = arith.mulf %413, %421 : vector<1x32xf32>
    %430 = arith.addf %428, %429 : vector<1x32xf32>
    %431 = math.tanh %430 : vector<1x32xf32>
    %432 = arith.mulf %427, %431 : vector<1x32xf32>
    %433 = vector.extract_strided_slice %285 {offsets = [5, 0], sizes = [1, 128], strides = [1, 1]} : vector<8x128xf32> to vector<1x128xf32>
    %c0_135 = arith.constant 0 : index
    %c0_136 = arith.constant 0 : index
    %434 = vector.load %arg6[%c0_135, %c0_136] : memref<32x128xf32, #tpu.memory_space<vmem>>, vector<32x128xf32>
    %cst_137 = arith.constant dense<0.000000e+00> : vector<1x128xf32>
    %435 = tpu.matmul %432, %434, %cst_137 {dimension_numbers = #tpu.dot_dimension_numbers<[1], [0], [0], [1], [0, 0, 1, 1], [], []>} : vector<1x32xf32>, vector<32x128xf32>, vector<1x128xf32> -> vector<1x128xf32>
    %436 = arith.addf %433, %435 : vector<1x128xf32>
    %437 = vector.extract_strided_slice %436 {offsets = [0, 0], sizes = [1, 32], strides = [1, 1]} : vector<1x128xf32> to vector<1x32xf32>
    %438 = arith.negf %437 : vector<1x32xf32>
    %439 = math.exp %438 : vector<1x32xf32>
    %cst_138 = arith.constant 1.000000e+00 : f32
    %440 = vector.broadcast %cst_138 : f32 to vector<1x32xf32>
    %441 = arith.addf %440, %439 : vector<1x32xf32>
    %442 = arith.divf %440, %441 : vector<1x32xf32>
    %443 = vector.extract_strided_slice %436 {offsets = [0, 32], sizes = [1, 32], strides = [1, 1]} : vector<1x128xf32> to vector<1x32xf32>
    %444 = arith.negf %443 : vector<1x32xf32>
    %445 = math.exp %444 : vector<1x32xf32>
    %cst_139 = arith.constant 1.000000e+00 : f32
    %446 = vector.broadcast %cst_139 : f32 to vector<1x32xf32>
    %447 = arith.addf %446, %445 : vector<1x32xf32>
    %448 = arith.divf %446, %447 : vector<1x32xf32>
    %449 = vector.extract_strided_slice %436 {offsets = [0, 64], sizes = [1, 32], strides = [1, 1]} : vector<1x128xf32> to vector<1x32xf32>
    %450 = math.tanh %449 : vector<1x32xf32>
    %451 = vector.extract_strided_slice %436 {offsets = [0, 96], sizes = [1, 32], strides = [1, 1]} : vector<1x128xf32> to vector<1x32xf32>
    %452 = arith.negf %451 : vector<1x32xf32>
    %453 = math.exp %452 : vector<1x32xf32>
    %cst_140 = arith.constant 1.000000e+00 : f32
    %454 = vector.broadcast %cst_140 : f32 to vector<1x32xf32>
    %455 = arith.addf %454, %453 : vector<1x32xf32>
    %456 = arith.divf %454, %455 : vector<1x32xf32>
    %457 = arith.mulf %448, %430 : vector<1x32xf32>
    %458 = arith.mulf %442, %450 : vector<1x32xf32>
    %459 = arith.addf %457, %458 : vector<1x32xf32>
    %460 = math.tanh %459 : vector<1x32xf32>
    %461 = arith.mulf %456, %460 : vector<1x32xf32>
    %462 = vector.extract_strided_slice %285 {offsets = [6, 0], sizes = [1, 128], strides = [1, 1]} : vector<8x128xf32> to vector<1x128xf32>
    %c0_141 = arith.constant 0 : index
    %c0_142 = arith.constant 0 : index
    %463 = vector.load %arg6[%c0_141, %c0_142] : memref<32x128xf32, #tpu.memory_space<vmem>>, vector<32x128xf32>
    %cst_143 = arith.constant dense<0.000000e+00> : vector<1x128xf32>
    %464 = tpu.matmul %461, %463, %cst_143 {dimension_numbers = #tpu.dot_dimension_numbers<[1], [0], [0], [1], [0, 0, 1, 1], [], []>} : vector<1x32xf32>, vector<32x128xf32>, vector<1x128xf32> -> vector<1x128xf32>
    %465 = arith.addf %462, %464 : vector<1x128xf32>
    %466 = vector.extract_strided_slice %465 {offsets = [0, 0], sizes = [1, 32], strides = [1, 1]} : vector<1x128xf32> to vector<1x32xf32>
    %467 = arith.negf %466 : vector<1x32xf32>
    %468 = math.exp %467 : vector<1x32xf32>
    %cst_144 = arith.constant 1.000000e+00 : f32
    %469 = vector.broadcast %cst_144 : f32 to vector<1x32xf32>
    %470 = arith.addf %469, %468 : vector<1x32xf32>
    %471 = arith.divf %469, %470 : vector<1x32xf32>
    %472 = vector.extract_strided_slice %465 {offsets = [0, 32], sizes = [1, 32], strides = [1, 1]} : vector<1x128xf32> to vector<1x32xf32>
    %473 = arith.negf %472 : vector<1x32xf32>
    %474 = math.exp %473 : vector<1x32xf32>
    %cst_145 = arith.constant 1.000000e+00 : f32
    %475 = vector.broadcast %cst_145 : f32 to vector<1x32xf32>
    %476 = arith.addf %475, %474 : vector<1x32xf32>
    %477 = arith.divf %475, %476 : vector<1x32xf32>
    %478 = vector.extract_strided_slice %465 {offsets = [0, 64], sizes = [1, 32], strides = [1, 1]} : vector<1x128xf32> to vector<1x32xf32>
    %479 = math.tanh %478 : vector<1x32xf32>
    %480 = vector.extract_strided_slice %465 {offsets = [0, 96], sizes = [1, 32], strides = [1, 1]} : vector<1x128xf32> to vector<1x32xf32>
    %481 = arith.negf %480 : vector<1x32xf32>
    %482 = math.exp %481 : vector<1x32xf32>
    %cst_146 = arith.constant 1.000000e+00 : f32
    %483 = vector.broadcast %cst_146 : f32 to vector<1x32xf32>
    %484 = arith.addf %483, %482 : vector<1x32xf32>
    %485 = arith.divf %483, %484 : vector<1x32xf32>
    %486 = arith.mulf %477, %459 : vector<1x32xf32>
    %487 = arith.mulf %471, %479 : vector<1x32xf32>
    %488 = arith.addf %486, %487 : vector<1x32xf32>
    %489 = math.tanh %488 : vector<1x32xf32>
    %490 = arith.mulf %485, %489 : vector<1x32xf32>
    %491 = vector.extract_strided_slice %285 {offsets = [7, 0], sizes = [1, 128], strides = [1, 1]} : vector<8x128xf32> to vector<1x128xf32>
    %c0_147 = arith.constant 0 : index
    %c0_148 = arith.constant 0 : index
    %492 = vector.load %arg6[%c0_147, %c0_148] : memref<32x128xf32, #tpu.memory_space<vmem>>, vector<32x128xf32>
    %cst_149 = arith.constant dense<0.000000e+00> : vector<1x128xf32>
    %493 = tpu.matmul %490, %492, %cst_149 {dimension_numbers = #tpu.dot_dimension_numbers<[1], [0], [0], [1], [0, 0, 1, 1], [], []>} : vector<1x32xf32>, vector<32x128xf32>, vector<1x128xf32> -> vector<1x128xf32>
    %494 = arith.addf %491, %493 : vector<1x128xf32>
    %495 = vector.extract_strided_slice %494 {offsets = [0, 0], sizes = [1, 32], strides = [1, 1]} : vector<1x128xf32> to vector<1x32xf32>
    %496 = arith.negf %495 : vector<1x32xf32>
    %497 = math.exp %496 : vector<1x32xf32>
    %cst_150 = arith.constant 1.000000e+00 : f32
    %498 = vector.broadcast %cst_150 : f32 to vector<1x32xf32>
    %499 = arith.addf %498, %497 : vector<1x32xf32>
    %500 = arith.divf %498, %499 : vector<1x32xf32>
    %501 = vector.extract_strided_slice %494 {offsets = [0, 32], sizes = [1, 32], strides = [1, 1]} : vector<1x128xf32> to vector<1x32xf32>
    %502 = arith.negf %501 : vector<1x32xf32>
    %503 = math.exp %502 : vector<1x32xf32>
    %cst_151 = arith.constant 1.000000e+00 : f32
    %504 = vector.broadcast %cst_151 : f32 to vector<1x32xf32>
    %505 = arith.addf %504, %503 : vector<1x32xf32>
    %506 = arith.divf %504, %505 : vector<1x32xf32>
    %507 = vector.extract_strided_slice %494 {offsets = [0, 64], sizes = [1, 32], strides = [1, 1]} : vector<1x128xf32> to vector<1x32xf32>
    %508 = math.tanh %507 : vector<1x32xf32>
    %509 = vector.extract_strided_slice %494 {offsets = [0, 96], sizes = [1, 32], strides = [1, 1]} : vector<1x128xf32> to vector<1x32xf32>
    %510 = arith.negf %509 : vector<1x32xf32>
    %511 = math.exp %510 : vector<1x32xf32>
    %cst_152 = arith.constant 1.000000e+00 : f32
    %512 = vector.broadcast %cst_152 : f32 to vector<1x32xf32>
    %513 = arith.addf %512, %511 : vector<1x32xf32>
    %514 = arith.divf %512, %513 : vector<1x32xf32>
    %515 = arith.mulf %506, %488 : vector<1x32xf32>
    %516 = arith.mulf %500, %508 : vector<1x32xf32>
    %517 = arith.addf %515, %516 : vector<1x32xf32>
    %518 = math.tanh %517 : vector<1x32xf32>
    %519 = arith.mulf %514, %518 : vector<1x32xf32>
    %c0_153 = arith.constant 0 : index
    %c0_154 = arith.constant 0 : index
    %520 = vector.load %arg8[%c0_153, %c0_154] : memref<1x32xf32, #tpu.memory_space<vmem>>, vector<1x32xf32>
    %521 = arith.mulf %519, %520 : vector<1x32xf32>
    %cst_155 = arith.constant dense<0.000000e+00> : vector<1xf32>
    %522 = vector.multi_reduction <add>, %521, %cst_155 [1] : vector<1x32xf32> to vector<1xf32>
    %523 = vector.shape_cast %522 : vector<1xf32> to vector<1x1xf32>
    %c0_156 = arith.constant 0 : index
    %c0_157 = arith.constant 0 : index
    %524 = vector.load %arg11[%c0_156, %c0_157] : memref<1x3xf32, #tpu.memory_space<vmem>>, vector<1x3xf32>
    %c0_158 = arith.constant 0 : index
    %c0_159 = arith.constant 0 : index
    %525 = vector.load %arg9[%c0_158, %c0_159] : memref<1x3xf32, #tpu.memory_space<vmem>>, vector<1x3xf32>
    %526 = arith.mulf %524, %525 : vector<1x3xf32>
    %cst_160 = arith.constant dense<0.000000e+00> : vector<1xf32>
    %527 = vector.multi_reduction <add>, %526, %cst_160 [1] : vector<1x3xf32> to vector<1xf32>
    %528 = vector.shape_cast %527 : vector<1xf32> to vector<1x1xf32>
    %529 = arith.addf %523, %528 : vector<1x1xf32>
    %c0_161 = arith.constant 0 : index
    %c0_162 = arith.constant 0 : index
    %530 = vector.load %arg10[%c0_161, %c0_162] : memref<1x1xf32, #tpu.memory_space<vmem>>, vector<1x1xf32>
    %531 = arith.addf %529, %530 : vector<1x1xf32>
    %c0_163 = arith.constant 0 : index
    %c0_164 = arith.constant 0 : index
    %532 = vector.load %arg12[%c0_163, %c0_164] : memref<1x1xf32, #tpu.memory_space<vmem>>, vector<1x1xf32>
    tpu.vector_store %arg12[%c0_163, %c0_164], %531 {strides = array<i32>} : memref<1x1xf32, #tpu.memory_space<vmem>>, vector<1x1xf32>,
    return
  }
}

</mosaic_0001>

<bundles_post_ra>
// kernel: args_nn_forward.1
= control target key start
LH: loop header
LB: loop body
LE: loop exit
PB: predicated region body
PF: predicated region fallthrough
CT: control target
= control target key end

     0   :  { %s3219_s0 = inlined_call_operand.vmem [shape: s32[8], index: 0, kind: input, shape index: {}]   ;;  %s3220_s1 = inlined_call_operand.vmem [shape: f32[40,32], index: 1, kind: input, shape index: {}]   ;;  %s3221_s2 = inlined_call_operand.vmem [shape: f32[32,128], index: 2, kind: input, shape index: {}]   ;;  %s3222_s3 = inlined_call_operand.vmem [shape: f32[32,128], index: 3, kind: input, shape index: {}]   ;;  %s3223_s4 = inlined_call_operand.vmem [shape: f32[1,128], index: 4, kind: input, shape index: {}]   ;;  %s3224_s5 = inlined_call_operand.vmem [shape: f32[32,128], index: 5, kind: input, shape index: {}]   ;;  %s3225_s6 = inlined_call_operand.hbm [shape: f32[32,128], index: 6, kind: input, shape index: {}]   ;;  %s3226_s7 = inlined_call_operand.hbm [shape: f32[1,128], index: 7, kind: input, shape index: {}]   ;;  %s3227_s8 = inlined_call_operand.vmem [shape: f32[1,32], index: 8, kind: input, shape index: {}]   ;;  %s3228_s9 = inlined_call_operand.vmem [shape: f32[1,3], index: 9, kind: input, shape index: {}]   ;;  %s3229_s10 = inlined_call_operand.<no memory space> [shape: f32[1,1], index: 10, kind: input, shape index: {}]   ;;  %s3230_s11 = inlined_call_operand.vmem [shape: f32[1,3], index: 11, kind: input, shape index: {}]   ;;  %s3231_s12 = inlined_call_operand.hbm [shape: f32[1,1], index: 12, kind: output, shape index: {}]  }
   0x1   :  { %v17_v0 = vstv %s3229_s10 }
   0x2   :  { %18 = vst [vmem:[#allocation4] sm:$0x1] %v17_v0 }
   0x3   :  { %19 = vsyncpa [#allocation8], 0 }
   0x4   :  { %20 = vsyncpa [#allocation6], 0 }
   0x5   :  { %21 = vsyncpa [#allocation11], 0 }
   0x6   :  { %22 = vsyncpa [#allocation7], 0  ;;  %s29_s25 = sshll.u32 %s3219_s0, 4  ;;  %s30_s25 = int_to_ptr.vmem [resolvable:$true] %s29_s25 }
   0x7   :  { %s2692_s26 = scalar_lea.vmem %s30_s25, 16  ;;  %p2697_p1 = scmp.lt.s32.totalorder %s30_s25, %s30_s25 }
   0x8   :  { %p2693_p0 = scmp.ne.s32.totalorder %s30_s25, %s2692_s26  ;;  %p2698_p2 = scmp.lt.s32.totalorder %s2692_s26, %s2692_s26 }
   0xa   :  { %p2699_p3 = por %p2698_p2, %p2697_p1 }
   0xc   :  { %p2700_p4 = pnand %p2699_p3, %p2693_p0 }
   0xe   :  { %2703 = shalt.err (!%p2700_p4)
}
   0xf   :  { %s2778_s27 = smov [#allocation5]   ;;  %s2779_s10 = smov [#allocation9]  }
  0x10   :  { %32 = dma.vmem_to_smem %s30_s25, 16, %s2778_s27, [#allocation8]  }
  0x11   :  { %s48_s28 = sshll.u32 %s2779_s10, 4  ;;  %s2704_s13 = scalar_lea.hbm %s3225_s6, 512  ;;  %s49_s28 = int_to_ptr.vmem [resolvable:$true] %s48_s28 }
  0x12   :  { %p2705_p5 = scmp.ne.s32.totalorder %s3225_s6, %s2704_s13  ;;  %p2708_p6 = scmp.lt.u32.totalorder %s2704_s13, %s3225_s6 }
  0x14   :  { %p2710_p7 = pnand %p2708_p6, %p2705_p5 }
  0x16   :  { %2713 = shalt.err (!%p2710_p7)
}
  0x17   :  { %s2714_s17 = scalar_lea.vmem %s49_s28, 512  ;;  %p2719_p9 = scmp.lt.s32.totalorder %s49_s28, %s49_s28 }
  0x18   :  { %p2715_p8 = scmp.ne.s32.totalorder %s49_s28, %s2714_s17  ;;  %p2720_p10 = scmp.lt.s32.totalorder %s2714_s17, %s2714_s17 }
  0x1a   :  { %p2721_p11 = por %p2720_p10, %p2719_p9 }
  0x1c   :  { %p2722_p12 = pnand %p2721_p11, %p2715_p8 }
  0x1e   :  { %2725 = shalt.err (!%p2722_p12)
}
  0x1f   :  { %s2780_s18 = smov 128   ;;  %s2781_s19 = smov 8  }
  0x20   :  { %54 = dma.hbm_to_vmem [thread:$0]  %s3225_s6, 512, %s49_s28, [#allocation6], %s2780_s18, %s2780_s18, %s2781_s19  }
  0x21   :  { %s2782_s22 = smov [#allocation10]   ;;  %s2726_s26 = scalar_lea.hbm %s3226_s7, 16 }
  0x22   :  { %s61_s23 = sshll.u32 %s2782_s22, 4  ;;  %p2727_p13 = scmp.ne.s32.totalorder %s3226_s7, %s2726_s26  ;;  %s62_s23 = int_to_ptr.vmem [resolvable:$true] %s61_s23 }
  0x23   :  { %p2730_p0 = scmp.lt.u32.totalorder %s2726_s26, %s3226_s7 }
  0x25   :  { %p2732_p1 = pnand %p2730_p0, %p2727_p13 }
  0x27   :  { %2735 = shalt.err (!%p2732_p1)
}
  0x28   :  { %s2736_s13 = scalar_lea.vmem %s62_s23, 16  ;;  %s2740_s6 = scalar_lea.vmem %s62_s23, 32 }
  0x29   :  { %p2737_p2 = scmp.ne.s32.totalorder %s62_s23, %s2736_s13  ;;  %p2741_p3 = scmp.lt.s32.totalorder %s62_s23, %s62_s23 }
  0x2a   :  { %p2742_p4 = scmp.lt.s32.totalorder %s2740_s6, %s2736_s13 }
  0x2c   :  { %p2743_p5 = por %p2742_p4, %p2741_p3 }
  0x2e   :  { %p2744_p6 = pnand %p2743_p5, %p2737_p2 }
  0x30   :  { %2747 = shalt.err (!%p2744_p6)
}
  0x31   :  { %64 = dma.hbm_to_vmem [thread:$0]  %s3226_s7, 16, %s62_s23, [#allocation11]  }
  0x32   :  { %2770 = dma.done.wait [#allocation8], 16  }
  0x33   :  { %2771 = vsyncadd [#allocation8], 4294967280 }
  0x34   :  { %2772 = dma.done.wait [#allocation6], 512  }
  0x35   :  { %2773 = vsyncadd [#allocation6], 4294966784 }
  0x36   :  { %2774 = dma.done.wait [#allocation11], 16  }
  0x37   :  { %2775 = vsyncadd [#allocation11], 4294967280 }
  0x38   :  { %82 = sfence }
  0x39   :  { %v117_v1 = vld [vmem:[%s3221_s2] sm:$0xff]  ;;  %v118_v2 = vld [vmem:[%s3221_s2 + $0x8] sm:$0xff]  ;;  %v2783_v4 = vmov 0.0|0.0   ;;  %v119_v7 = vld [vmem:[%s3221_s2 + $0x10] sm:$0xff]  ;;  %s83_s25 = sld [smem:[#allocation5]]  ;;  %vm2784_vm0 = vmmov 0  }
  0x3a   :  { %v202_v3 = vld [vmem:[%s3222_s3] sm:$0xff]  ;;  %2444 = vmatprep.subr.bf16.mxu0 %v2783_v4  ;;  %v2445_v5 = vpack.c.bf16 %v118_v2, %v117_v1  ;;  %2450 = vmatprep.subr.bf16.mxu1 %v2783_v4  ;;  %v203_v6 = vld [vmem:[%s3222_s3 + $0x8] sm:$0xff]  ;;  %v120_v8 = vld [vmem:[%s3221_s2 + $0x18] sm:$0xff]  ;;  %v2785_v12 = vmov 0.0   ;;  %s2113_s30 = sld [smem:[#allocation5 + $0x1]]  ;;  %s2114_s13 = sld [smem:[#allocation5 + $0x2]] }
  0x3b   :  { %v2905_v9 = vpack.c.bf16 %v203_v6, %v202_v3  ;;  %v204_v10 = vld [vmem:[%s3222_s3 + $0x10] sm:$0xff]  ;;  %v205_v11 = vld [vmem:[%s3222_s3 + $0x18] sm:$0xff]  ;;  %2254 = vmatprep.mubr.msk.f32.mxu0 %vm2784_vm0, %v2785_v12  ;;  %2265 = vmatprep.mubr.msk.f32.mxu1 %vm2784_vm0, %v2785_v12  ;;  %v2448_v13 = vpack.c.bf16 %v120_v8, %v119_v7  ;;  %s2115_s2 = sld [smem:[#allocation5 + $0x3]]  ;;  %s2116_s6 = sld [smem:[#allocation5 + $0x4]]  ;;  %vm86_vm1 = vcmask 253952   ;;  %vm128_vm2 = vcmask 261120  }
  0x3c   :  { %2446 = vmatpush3.bf16.msra.mxu0 %v2445_v5  ;;  %v2919_v14 = vpack.c.bf16 %v205_v11, %v204_v10  ;;  %s2117_s3 = sld [smem:[#allocation5 + $0x5]]  ;;  %s2118_s28 = sld [smem:[#allocation5 + $0x6]]  ;;  %v2120_v26 = vld [vmem:[%s3223_s4] ss:$0 sm:$0xff]  ;;  %vm420_vm3 = vcmask 254977   ;;  %vm652_vm4 = vcmask 257027  }
  0x3d   :  { %2452 = vmatpush3.bf16.msra.mxu1 %v2905_v9  ;;  %2447 = vmatprep.subr.bf16.mxu0 %v2783_v4  ;;  %s2922_s14 = sld [smem:[#allocation5 + $0x7]]  ;;  %s2787_s4 = smov 32   ;;  %vm884_vm5 = vcmask 259077   ;;  %vm536_vm6 = vcmask 256002   ;;  %vm768_vm7 = vcmask 258052   ;;  %vm1000_vm8 = vcmask 260102  }
  0x3e   :  { %2453 = vmatprep.subr.bf16.mxu1 %v2783_v4  ;;  %vm1116_vm9 = vcmask 261127   ;;  %vm2070_vm10 = vcmask 16384   ;;  %vm2086_vm11 = vcmask 7175  }
  0x3f   :  { %s84_s16 = scalar_lea.vmem %s3220_s1, %s83_s25 }
  0x40   :  { %2449 = vmatpush3.bf16.msra.mxu0 %v2448_v13  ;;  %v85_v15 = vld [vmem:[%s84_s16] sm:$0x1]  ;;  %s89_s19 = scalar_lea.vmem %s3220_s1, %s2113_s30  ;;  %s93_s21 = scalar_lea.vmem %s3220_s1, %s2114_s13 }
  0x41   :  { %2455 = vmatpush3.bf16.msra.mxu1 %v2919_v14  ;;  %2456 = vmatprep.subr.bf16.mxu0 %v2783_v4  ;;  %87 = vst.msk [vmem:[#allocation2] sm:$0x1] %vm86_vm1, %v85_v15  ;;  %v90_v16 = vld [vmem:[%s89_s19] sm:$0x1]  ;;  %s97_s24 = scalar_lea.vmem %s3220_s1, %s2115_s2  ;;  %s101_s27 = scalar_lea.vmem %s3220_s1, %s2116_s6 }
  0x42   :  { %v94_v17 = vld [vmem:[%s93_s21] sm:$0x1]  ;;  %2462 = vmatprep.subr.bf16.mxu1 %v2783_v4  ;;  %91 = vst.msk [vmem:[#allocation2 + $0x1] sm:$0x1] %vm86_vm1, %v90_v16  ;;  %s105_s30 = scalar_lea.vmem %s3220_s1, %s2117_s3  ;;  %s109_s2 = scalar_lea.vmem %s3220_s1, %s2118_s28 }
  0x43   :  { %95 = vst.msk [vmem:[#allocation2 + $0x2] sm:$0x1] %vm86_vm1, %v94_v17  ;;  %v98_v18 = vld [vmem:[%s97_s24] sm:$0x1]  ;;  %s113_s16 = scalar_lea.vmem %s3220_s1, %s2922_s14  ;;  %s2786_s28 = smov 64  }
  0x44   :  { %v102_v19 = vld [vmem:[%s101_s27] sm:$0x1]  ;;  %99 = vst.msk [vmem:[#allocation2 + $0x3] sm:$0x1] %vm86_vm1, %v98_v18  ;;  %2266 = vmatmul.mubr.f32.vlgmr.msra.gmra.mrb[0].mxu1 %v2785_v12  ;;  %s2788_s24 = smov 96  }
  0x45   :  { %103 = vst.msk [vmem:[#allocation2 + $0x4] sm:$0x1] %vm86_vm1, %v102_v19  ;;  %v106_v20 = vld [vmem:[%s105_s30] sm:$0x1]  ;;  %2464 = vmatpush3.bf16.msra.mxu1 %v2905_v9  ;;  %2287 = vmatprep.mubr.msk.f32.mxu1 %vm2784_vm0, %v2785_v12 }
  0x46   :  { %v110_v21 = vld [vmem:[%s109_s2] sm:$0x1]  ;;  %107 = vst.msk [vmem:[#allocation2 + $0x5] sm:$0x1] %vm86_vm1, %v106_v20  ;;  %2465 = vmatprep.subr.bf16.mxu1 %v2783_v4 }
  0x47   :  { %111 = vst.msk [vmem:[#allocation2 + $0x6] sm:$0x1] %vm86_vm1, %v110_v21  ;;  %v114_v22 = vld [vmem:[%s113_s16] sm:$0x1] }
  0x48   :  { %115 = vst.msk [vmem:[#allocation2 + $0x7] sm:$0x1] %vm86_vm1, %v114_v22 }
  0x49   :  { %2467 = vmatpush3.bf16.msra.mxu1 %v2919_v14 }
  0x4a   :  { %2474 = vmatprep.subr.bf16.mxu1 %v2783_v4 }
  0x4f   :  { %v116_v23 = vld [vmem:[#allocation2] sm:$0xff] }
  0x50   :  { %2255 = vmatmul.mubr.msk.f32.vlgmr.msra.gmra.mrb[0].mxu0 %vm128_vm2, %v116_v23 }
  0x51   :  { %2458 = vmatpush3.bf16.msra.mxu0 %v2905_v9  ;;  %2276 = vmatprep.mubr.msk.f32.mxu0 %vm2784_vm0, %v2785_v12 }
  0x52   :  { %2459 = vmatprep.subr.bf16.mxu0 %v2783_v4 }
  0x55   :  { %2461 = vmatpush3.bf16.msra.mxu0 %v2919_v14 }
  0x56   :  { %2468 = vmatprep.subr.bf16.mxu0 %v2783_v4 }
 0x117   :  { %v275_v24 = vpop.f32.mrb[0].mxu1 }
 0x118   :  { %v2267_v25 = vpop.f32.mrb[1].mxu1 }
 0x123   :  { %v198_v27 = vpop.f32.mrb[0].mxu0 }
 0x124   :  { %v2977_v28 = vadd.f32 %v2120_v26, %v198_v27  ;;  %v2256_v29 = vpop.f32.mrb[1].mxu0 }
 0x126   :  { %v279_v30 = vadd.f32 %v275_v24, %v2977_v28 }
 0x128   :  { %2564 = vtanh.f32 %v279_v30  ;;  %v2122_v32 = vmul.f32 -1.442695, %v279_v30 }
 0x12a   :  { %2566 = vpow2.f32 %v2122_v32 }
 0x132   :  { %v2565_v31 = vpop.eup %2564 }
 0x133   :  { %289 = vrot.lane.b32.xlu0 %v2565_v31, %s2786_s28 }
 0x134   :  { %v2567_v33 = vpop.eup %2566 }
 0x135   :  { %v283_v34 = vadd.f32 1.0, %v2567_v33 }
 0x137   :  { %2568 = vrcp.f32 %v283_v34 }
 0x141   :  { %v2569_v35 = vpop.eup %2568 }
 0x142   :  { %v287_v38 = vmul.f32 0.0, %v2569_v35 }
 0x1a5   :  { %v290_v36 = vpop.permute.xlu0 %289 }
 0x1a6   :  { %v292_v37 = vmul.f32 %v2569_v35, %v290_v36 }
 0x1a8   :  { %294 = vrot.lane.b32.xlu0 %v292_v37, %s2787_s4 }
 0x21a   :  { %v295_v39 = vpop.permute.xlu0 %294 }
 0x21b   :  { %v297_v40 = vadd.f32 %v295_v39, %v287_v38 }
 0x21d   :  { %2570 = vtanh.f32 %v297_v40  ;;  %v397_v56 = vrot.slane %v297_v40, 7 }
 0x227   :  { %v2571_v41 = vpop.eup %2570 }
 0x228   :  { %300 = vrot.lane.b32.xlu1 %v2571_v41, %s2786_s28 }
 0x29a   :  { %v301_v42 = vpop.permute.xlu1 %300 }
 0x29b   :  { %v303_v43 = vmul.f32 %v2569_v35, %v301_v42 }
 0x29d   :  { %305 = vrot.lane.b32.xlu1 %v303_v43, %s2787_s4 }
 0x30f   :  { %v306_v44 = vpop.permute.xlu1 %305 }
 0x310   :  { %308 = vst.msk [vmem:[#allocation3] sm:$0x1] %vm86_vm1, %v306_v44  ;;  %2277 = vmatmul.mubr.msk.f32.vlgmr.msra.gmra.mrb[2].mxu0 %vm128_vm2, %v306_v44 }
 0x311   :  { %2470 = vmatpush3.bf16.msra.mxu0 %v2905_v9  ;;  %2298 = vmatprep.mubr.msk.f32.mxu0 %vm2784_vm0, %v2785_v12 }
 0x312   :  { %2471 = vmatprep.subr.bf16.mxu0 %v2783_v4 }
 0x315   :  { %2473 = vmatpush3.bf16.msra.mxu0 %v2919_v14 }
 0x316   :  { %2480 = vmatprep.subr.bf16.mxu0 %v2783_v4 }
 0x3e3   :  { %v381_v45 = vpop.f32.mrb[2].mxu0 }
 0x3e4   :  { %v386_v46 = vrot.slane %v381_v45, 7  ;;  %v2278_v47 = vpop.f32.mrb[3].mxu0 }
 0x3e6   :  { %v388_v48 = vadd.f32 %v386_v46, %v2977_v28 }
 0x3e8   :  { %2572 = vtanh.f32 %v388_v48  ;;  %v2124_v50 = vmul.f32 -1.442695, %v388_v48 }
 0x3ea   :  { %2574 = vpow2.f32 %v2124_v50 }
 0x3f2   :  { %v2573_v49 = vpop.eup %2572 }
 0x3f3   :  { %401 = vrot.lane.b32.xlu0 %v2573_v49, %s2786_s28 }
 0x3f4   :  { %v2575_v51 = vpop.eup %2574 }
 0x3f5   :  { %v392_v52 = vadd.f32 1.0, %v2575_v51 }
 0x3f7   :  { %2576 = vrcp.f32 %v392_v52 }
 0x401   :  { %v2577_v53 = vpop.eup %2576 }
 0x402   :  { %v399_v57 = vmul.f32 %v2577_v53, %v397_v56 }
 0x465   :  { %v402_v54 = vpop.permute.xlu0 %401 }
 0x466   :  { %v404_v55 = vmul.f32 %v2577_v53, %v402_v54 }
 0x468   :  { %406 = vrot.lane.b32.xlu1 %v404_v55, %s2787_s4 }
 0x4da   :  { %v407_v58 = vpop.permute.xlu1 %406 }
 0x4db   :  { %v409_v59 = vadd.f32 %v407_v58, %v399_v57 }
 0x4dd   :  { %2578 = vtanh.f32 %v409_v59  ;;  %v513_v16 = vrot.slane %v409_v59, 7 }
 0x4e7   :  { %v2579_v60 = vpop.eup %2578 }
 0x4e8   :  { %412 = vrot.lane.b32.xlu0 %v2579_v60, %s2786_s28 }
 0x55a   :  { %v413_v61 = vpop.permute.xlu0 %412 }
 0x55b   :  { %v2996_v62 = vmul.f32 %v2577_v53, %v413_v61 }
 0x55d   :  { %v426_v63 = vrot.slane %v2996_v62, 1 }
 0x55f   :  { %427 = vrot.lane.b32.xlu1 %v426_v63, %s2787_s4 }
 0x5d1   :  { %v428_v0 = vpop.permute.xlu1 %427 }
 0x5d2   :  { %2288 = vmatmul.mubr.msk.f32.vlgmr.msra.gmra.mrb[2].mxu1 %vm128_vm2, %v428_v0 }
 0x5d3   :  { %2476 = vmatpush3.bf16.msra.mxu1 %v2905_v9  ;;  %2309 = vmatprep.mubr.msk.f32.mxu1 %vm2784_vm0, %v2785_v12 }
 0x5d4   :  { %2477 = vmatprep.subr.bf16.mxu1 %v2783_v4 }
 0x5d7   :  { %2479 = vmatpush3.bf16.msra.mxu1 %v2919_v14 }
 0x5d8   :  { %2486 = vmatprep.subr.bf16.mxu1 %v2783_v4 }
 0x6a5   :  { %v497_v1 = vpop.f32.mrb[2].mxu1 }
 0x6a6   :  { %v502_v2 = vrot.slane %v497_v1, 6  ;;  %v2289_v3 = vpop.f32.mrb[3].mxu1 }
 0x6a8   :  { %v504_v5 = vadd.f32 %v502_v2, %v2977_v28 }
 0x6aa   :  { %2580 = vtanh.f32 %v504_v5  ;;  %v2126_v7 = vmul.f32 -1.442695, %v504_v5 }
 0x6ac   :  { %2582 = vpow2.f32 %v2126_v7 }
 0x6b4   :  { %v2581_v6 = vpop.eup %2580 }
 0x6b5   :  { %517 = vrot.lane.b32.xlu0 %v2581_v6, %s2786_s28 }
 0x6b6   :  { %v2583_v8 = vpop.eup %2582 }
 0x6b7   :  { %v508_v10 = vadd.f32 1.0, %v2583_v8 }
 0x6b9   :  { %2584 = vrcp.f32 %v508_v10 }
 0x6c3   :  { %v2585_v11 = vpop.eup %2584 }
 0x6c4   :  { %v515_v17 = vmul.f32 %v2585_v11, %v513_v16 }
 0x727   :  { %v518_v13 = vpop.permute.xlu0 %517 }
 0x728   :  { %v520_v15 = vmul.f32 %v2585_v11, %v518_v13 }
 0x72a   :  { %522 = vrot.lane.b32.xlu1 %v520_v15, %s2787_s4 }
 0x79c   :  { %v523_v18 = vpop.permute.xlu1 %522 }
 0x79d   :  { %v525_v19 = vadd.f32 %v523_v18, %v515_v17 }
 0x79f   :  { %2586 = vtanh.f32 %v525_v19  ;;  %v629_v37 = vrot.slane %v525_v19, 7 }
 0x7a9   :  { %v2587_v20 = vpop.eup %2586 }
 0x7aa   :  { %528 = vrot.lane.b32.xlu0 %v2587_v20, %s2786_s28 }
 0x81c   :  { %v529_v21 = vpop.permute.xlu0 %528 }
 0x81d   :  { %v3011_v22 = vmul.f32 %v2585_v11, %v529_v21 }
 0x81f   :  { %v542_v23 = vrot.slane %v3011_v22, 2 }
 0x821   :  { %543 = vrot.lane.b32.xlu1 %v542_v23, %s2787_s4 }
 0x893   :  { %v544_v24 = vpop.permute.xlu1 %543 }
 0x894   :  { %2299 = vmatmul.mubr.msk.f32.vlgmr.msra.gmra.mrb[4].mxu0 %vm128_vm2, %v544_v24 }
 0x895   :  { %2482 = vmatpush3.bf16.msra.mxu0 %v2905_v9  ;;  %2320 = vmatprep.mubr.msk.f32.mxu0 %vm2784_vm0, %v2785_v12 }
 0x896   :  { %2483 = vmatprep.subr.bf16.mxu0 %v2783_v4 }
 0x899   :  { %2485 = vmatpush3.bf16.msra.mxu0 %v2919_v14 }
 0x89a   :  { %2492 = vmatprep.subr.bf16.mxu0 %v2783_v4 }
 0x967   :  { %v613_v25 = vpop.f32.mrb[4].mxu0 }
 0x968   :  { %v618_v26 = vrot.slane %v613_v25, 5  ;;  %v2300_v27 = vpop.f32.mrb[5].mxu0 }
 0x96a   :  { %v620_v29 = vadd.f32 %v618_v26, %v2977_v28 }
 0x96c   :  { %2588 = vtanh.f32 %v620_v29  ;;  %v2128_v31 = vmul.f32 -1.442695, %v620_v29 }
 0x96e   :  { %2590 = vpow2.f32 %v2128_v31 }
 0x976   :  { %v2589_v30 = vpop.eup %2588 }
 0x977   :  { %633 = vrot.lane.b32.xlu0 %v2589_v30, %s2786_s28 }
 0x978   :  { %v2591_v32 = vpop.eup %2590 }
 0x979   :  { %v624_v33 = vadd.f32 1.0, %v2591_v32 }
 0x97b   :  { %2592 = vrcp.f32 %v624_v33 }
 0x985   :  { %v2593_v34 = vpop.eup %2592 }
 0x986   :  { %v631_v38 = vmul.f32 %v2593_v34, %v629_v37 }
 0x9e9   :  { %v634_v35 = vpop.permute.xlu0 %633 }
 0x9ea   :  { %v636_v36 = vmul.f32 %v2593_v34, %v634_v35 }
 0x9ec   :  { %638 = vrot.lane.b32.xlu1 %v636_v36, %s2787_s4 }
 0xa5e   :  { %v639_v39 = vpop.permute.xlu1 %638 }
 0xa5f   :  { %v641_v40 = vadd.f32 %v639_v39, %v631_v38 }
 0xa61   :  { %2594 = vtanh.f32 %v641_v40  ;;  %v745_v57 = vrot.slane %v641_v40, 7 }
 0xa6b   :  { %v2595_v41 = vpop.eup %2594 }
 0xa6c   :  { %644 = vrot.lane.b32.xlu0 %v2595_v41, %s2786_s28 }
 0xade   :  { %v645_v42 = vpop.permute.xlu0 %644 }
 0xadf   :  { %v3026_v43 = vmul.f32 %v2593_v34, %v645_v42 }
 0xae1   :  { %v658_v44 = vrot.slane %v3026_v43, 3 }
 0xae3   :  { %659 = vrot.lane.b32.xlu1 %v658_v44, %s2787_s4 }
 0xb55   :  { %v660_v45 = vpop.permute.xlu1 %659 }
 0xb56   :  { %2310 = vmatmul.mubr.msk.f32.vlgmr.msra.gmra.mrb[4].mxu1 %vm128_vm2, %v660_v45 }
 0xb57   :  { %2488 = vmatpush3.bf16.msra.mxu1 %v2905_v9  ;;  %2331 = vmatprep.mubr.msk.f32.mxu1 %vm2784_vm0, %v2785_v12 }
 0xb58   :  { %2489 = vmatprep.subr.bf16.mxu1 %v2783_v4 }
 0xb5b   :  { %2491 = vmatpush3.bf16.msra.mxu1 %v2919_v14 }
 0xb5c   :  { %2498 = vmatprep.subr.bf16.mxu1 %v2783_v4 }
 0xc29   :  { %v729_v46 = vpop.f32.mrb[4].mxu1 }
 0xc2a   :  { %v734_v47 = vrot.slane %v729_v46, 4  ;;  %v2311_v48 = vpop.f32.mrb[5].mxu1 }
 0xc2c   :  { %v736_v49 = vadd.f32 %v734_v47, %v2977_v28 }
 0xc2e   :  { %2596 = vtanh.f32 %v736_v49  ;;  %v2130_v51 = vmul.f32 -1.442695, %v736_v49 }
 0xc30   :  { %2598 = vpow2.f32 %v2130_v51 }
 0xc38   :  { %v2597_v50 = vpop.eup %2596 }
 0xc39   :  { %749 = vrot.lane.b32.xlu0 %v2597_v50, %s2786_s28 }
 0xc3a   :  { %v2599_v52 = vpop.eup %2598 }
 0xc3b   :  { %v740_v53 = vadd.f32 1.0, %v2599_v52 }
 0xc3d   :  { %2600 = vrcp.f32 %v740_v53 }
 0xc47   :  { %v2601_v54 = vpop.eup %2600 }
 0xc48   :  { %v747_v58 = vmul.f32 %v2601_v54, %v745_v57 }
 0xcab   :  { %v750_v55 = vpop.permute.xlu0 %749 }
 0xcac   :  { %v752_v56 = vmul.f32 %v2601_v54, %v750_v55 }
 0xcae   :  { %754 = vrot.lane.b32.xlu1 %v752_v56, %s2787_s4 }
 0xd20   :  { %v755_v59 = vpop.permute.xlu1 %754 }
 0xd21   :  { %v757_v60 = vadd.f32 %v755_v59, %v747_v58 }
 0xd23   :  { %2602 = vtanh.f32 %v757_v60 }
 0xd2d   :  { %v2603_v61 = vpop.eup %2602 }
 0xd2e   :  { %760 = vrot.lane.b32.xlu0 %v2603_v61, %s2786_s28 }
 0xda0   :  { %v761_v63 = vpop.permute.xlu0 %760 }
 0xda1   :  { %v3041_v0 = vmul.f32 %v2601_v54, %v761_v63 }
 0xda3   :  { %v774_v1 = vrot.slane %v3041_v0, 4 }
 0xda5   :  { %775 = vrot.lane.b32.xlu1 %v774_v1, %s2787_s4 }
 0xe17   :  { %v776_v2 = vpop.permute.xlu1 %775 }
 0xe18   :  { %2321 = vmatmul.mubr.msk.f32.vlgmr.msra.gmra.mrb[6].mxu0 %vm128_vm2, %v776_v2 }
 0xe19   :  { %2494 = vmatpush3.bf16.msra.mxu0 %v2905_v9  ;;  %2342 = vmatprep.mubr.msk.f32.mxu0 %vm2784_vm0, %v2785_v12 }
 0xe1a   :  { %2495 = vmatprep.subr.bf16.mxu0 %v2783_v4 }
 0xe1d   :  { %2497 = vmatpush3.bf16.msra.mxu0 %v2919_v14  ;;  %v861_v14 = vrot.slane %v757_v60, 7 }
 0xe1e   :  { %2504 = vmatprep.subr.bf16.mxu0 %v2783_v4 }
 0xeeb   :  { %v845_v3 = vpop.f32.mrb[6].mxu0 }
 0xeec   :  { %v850_v5 = vrot.slane %v845_v3, 3  ;;  %v2322_v6 = vpop.f32.mrb[7].mxu0 }
 0xeed   :  { %v1203_v6 = vld [vmem:[#allocation9] sm:$0xff] }
 0xeee   :  { %v852_v7 = vadd.f32 %v850_v5, %v2977_v28 }
 0xef0   :  { %2604 = vtanh.f32 %v852_v7  ;;  %v2132_v10 = vmul.f32 -1.442695, %v852_v7  ;;  %v1204_v7 = vld [vmem:[#allocation9 + $0x8] sm:$0xff] }
 0xef2   :  { %2606 = vpow2.f32 %v2132_v10  ;;  %v1205_v10 = vld [vmem:[#allocation9 + $0x10] sm:$0xff] }
 0xefa   :  { %v2605_v8 = vpop.eup %2604 }
 0xefb   :  { %865 = vrot.lane.b32.xlu0 %v2605_v8, %s2786_s28  ;;  %v3088_v8 = vpack.c.bf16 %v1204_v7, %v1203_v6 }
 0xefc   :  { %v2607_v9 = vpop.eup %2606 }
 0xefd   :  { %v856_v11 = vadd.f32 1.0, %v2607_v9 }
 0xeff   :  { %2608 = vrcp.f32 %v856_v11  ;;  %v1206_v11 = vld [vmem:[#allocation9 + $0x18] sm:$0xff] }
 0xf09   :  { %v2609_v13 = vpop.eup %2608 }
 0xf0a   :  { %v863_v17 = vmul.f32 %v2609_v13, %v861_v14 }
 0xf6d   :  { %v866_v15 = vpop.permute.xlu0 %865 }
 0xf6e   :  { %v868_v16 = vmul.f32 %v2609_v13, %v866_v15 }
 0xf70   :  { %870 = vrot.lane.b32.xlu1 %v868_v16, %s2787_s4 }
 0xfe2   :  { %v871_v18 = vpop.permute.xlu1 %870 }
 0xfe3   :  { %v873_v19 = vadd.f32 %v871_v18, %v863_v17 }
 0xfe5   :  { %2610 = vtanh.f32 %v873_v19  ;;  %v977_v38 = vrot.slane %v873_v19, 7 }
 0xfef   :  { %v2611_v20 = vpop.eup %2610 }
 0xff0   :  { %876 = vrot.lane.b32.xlu0 %v2611_v20, %s2786_s28 }
0x1062   :  { %v877_v21 = vpop.permute.xlu0 %876 }
0x1063   :  { %v879_v23 = vmul.f32 %v2609_v13, %v877_v21  ;;  %v3098_v13 = vpack.c.bf16 %v1206_v11, %v1205_v10 }
0x1065   :  { %v890_v24 = vrot.slane %v879_v23, 5 }
0x1067   :  { %891 = vrot.lane.b32.xlu1 %v890_v24, %s2787_s4  ;;  %v2137_v24 = vld [vmem:[#allocation10] ss:$0 sm:$0xff] }
0x10d9   :  { %v892_v25 = vpop.permute.xlu1 %891 }
0x10da   :  { %2332 = vmatmul.mubr.msk.f32.vlgmr.msra.gmra.mrb[6].mxu1 %vm128_vm2, %v892_v25 }
0x10db   :  { %2353 = vmatprep.mubr.msk.f32.mxu1 %vm2784_vm0, %v2785_v12 }
0x11ad   :  { %v961_v26 = vpop.f32.mrb[6].mxu1 }
0x11ae   :  { %v966_v27 = vrot.slane %v961_v26, 2  ;;  %v2333_v29 = vpop.f32.mrb[7].mxu1 }
0x11b0   :  { %v968_v30 = vadd.f32 %v966_v27, %v2977_v28 }
0x11b2   :  { %2612 = vtanh.f32 %v968_v30  ;;  %v2134_v32 = vmul.f32 -1.442695, %v968_v30 }
0x11b4   :  { %2614 = vpow2.f32 %v2134_v32 }
0x11bc   :  { %v2613_v31 = vpop.eup %2612 }
0x11bd   :  { %981 = vrot.lane.b32.xlu0 %v2613_v31, %s2786_s28 }
0x11be   :  { %v2615_v33 = vpop.eup %2614 }
0x11bf   :  { %v972_v34 = vadd.f32 1.0, %v2615_v33 }
0x11c1   :  { %2616 = vrcp.f32 %v972_v34 }
0x11cb   :  { %v2617_v35 = vpop.eup %2616 }
0x11cc   :  { %v979_v39 = vmul.f32 %v2617_v35, %v977_v38 }
0x122f   :  { %v982_v36 = vpop.permute.xlu0 %981 }
0x1230   :  { %v984_v37 = vmul.f32 %v2617_v35, %v982_v36 }
0x1232   :  { %986 = vrot.lane.b32.xlu1 %v984_v37, %s2787_s4 }
0x12a4   :  { %v987_v40 = vpop.permute.xlu1 %986 }
0x12a5   :  { %v989_v41 = vadd.f32 %v987_v40, %v979_v39 }
0x12a7   :  { %2618 = vtanh.f32 %v989_v41 }
0x12b1   :  { %v2619_v42 = vpop.eup %2618 }
0x12b2   :  { %992 = vrot.lane.b32.xlu0 %v2619_v42, %s2786_s28 }
0x1324   :  { %v993_v44 = vpop.permute.xlu0 %992 }
0x1325   :  { %v995_v45 = vmul.f32 %v2617_v35, %v993_v44 }
0x1327   :  { %v1006_v46 = vrot.slane %v995_v45, 6 }
0x1329   :  { %1007 = vrot.lane.b32.xlu1 %v1006_v46, %s2787_s4 }
0x139b   :  { %v1008_v47 = vpop.permute.xlu1 %1007 }
0x139c   :  { %2343 = vmatmul.mubr.msk.f32.vlgmr.msra.gmra.mrb[8].mxu0 %vm128_vm2, %v1008_v47 }
0x139d   :  { %2364 = vmatprep.mubr.msk.f32.mxu0 %vm2784_vm0, %v2785_v12  ;;  %2506 = vmatpush3.bf16.msra.mxu0 %v3088_v8 }
0x139e   :  { %2507 = vmatprep.subr.bf16.mxu0 %v2783_v4 }
0x13a1   :  { %2509 = vmatpush3.bf16.msra.mxu0 %v3098_v13 }
0x13a2   :  { %2516 = vmatprep.subr.bf16.mxu0 %v2783_v4 }
0x13a4   :  { %2365 = vmatmul.mubr.f32.vlgmr.msra.gmra.mrb[10].mxu0 %v2785_v12 }
0x13a5   :  { %2518 = vmatpush3.bf16.msra.mxu0 %v3088_v8  ;;  %2386 = vmatprep.mubr.msk.f32.mxu0 %vm2784_vm0, %v2785_v12 }
0x13a6   :  { %2519 = vmatprep.subr.bf16.mxu0 %v2783_v4 }
0x13a9   :  { %2521 = vmatpush3.bf16.msra.mxu0 %v3098_v13 }
0x13aa   :  { %2528 = vmatprep.subr.bf16.mxu0 %v2783_v4 }
0x146f   :  { %v1077_v48 = vpop.f32.mrb[8].mxu0 }
0x1470   :  { %v1082_v49 = vrot.slane %v1077_v48, 1  ;;  %v2344_v50 = vpop.f32.mrb[9].mxu0 }
0x1472   :  { %v1084_v51 = vadd.f32 %v1082_v49, %v2977_v28  ;;  %v1093_v28 = vrot.slane %v989_v41, 7 }
0x1474   :  { %2620 = vtanh.f32 %v1084_v51  ;;  %v2136_v53 = vmul.f32 -1.442695, %v1084_v51 }
0x1476   :  { %2622 = vpow2.f32 %v2136_v53 }
0x1477   :  { %v1273_v21 = vpop.f32.mrb[10].mxu0 }
0x147e   :  { %v2621_v52 = vpop.eup %2620 }
0x147f   :  { %1097 = vrot.lane.b32.xlu0 %v2621_v52, %s2786_s28 }
0x1480   :  { %v2623_v54 = vpop.eup %2622 }
0x1481   :  { %v1088_v55 = vadd.f32 1.0, %v2623_v54 }
0x1483   :  { %2624 = vrcp.f32 %v1088_v55 }
0x148d   :  { %v2625_v56 = vpop.eup %2624 }
0x148e   :  { %v1095_v59 = vmul.f32 %v2625_v56, %v1093_v28 }
0x14f1   :  { %v1098_v57 = vpop.permute.xlu0 %1097 }
0x14f2   :  { %v1100_v58 = vmul.f32 %v2625_v56, %v1098_v57 }
0x14f4   :  { %1102 = vrot.lane.b32.xlu1 %v1100_v58, %s2787_s4 }
0x14f8   :  { %417 = vrot.lane.b32.xlu1 %v2996_v62, %s2787_s4  ;;  %v1119_v62 = vld [vmem:[%s3224_s5] sm:$0xff] }
0x14fc   :  { %649 = vrot.lane.b32.xlu1 %v3026_v43, %s2787_s4  ;;  %v1120_v43 = vld [vmem:[%s3224_s5 + $0x8] sm:$0xff] }
0x14fd   :  { %v2499_v5 = vpack.c.bf16 %v1120_v43, %v1119_v62 }
0x14ff   :  { %2500 = vmatpush3.bf16.msra.mxu1 %v2499_v5 }
0x1500   :  { %881 = vrot.lane.b32.xlu1 %v879_v23, %s2787_s4  ;;  %2501 = vmatprep.subr.bf16.mxu1 %v2783_v4  ;;  %v2366_v23 = vpop.f32.mrb[11].mxu0 }
0x1566   :  { %v1103_v60 = vpop.permute.xlu1 %1102 }
0x1567   :  { %v1105_v61 = vadd.f32 %v1103_v60, %v1095_v59 }
0x1569   :  { %2626 = vtanh.f32 %v1105_v61 }
0x156a   :  { %v418_v63 = vpop.permute.xlu1 %417 }
0x156b   :  { %421 = vst.msk [vmem:[#allocation3] sm:$0x2] %vm420_vm3, %v418_v63 }
0x156e   :  { %v650_v1 = vpop.permute.xlu1 %649 }
0x156f   :  { %653 = vst.msk [vmem:[#allocation3] sm:$0x8] %vm652_vm4, %v650_v1 }
0x1572   :  { %v882_v2 = vpop.permute.xlu1 %881 }
0x1573   :  { %v2627_v3 = vpop.eup %2626  ;;  %885 = vst.msk [vmem:[#allocation3] sm:$0x20] %vm884_vm5, %v882_v2 }
0x1574   :  { %1108 = vrot.lane.b32.xlu0 %v2627_v3, %s2786_s28 }
0x1578   :  { %533 = vrot.lane.b32.xlu0 %v3011_v22, %s2787_s4  ;;  %v1121_v22 = vld [vmem:[%s3224_s5 + $0x10] sm:$0xff] }
0x157c   :  { %765 = vrot.lane.b32.xlu0 %v3041_v0, %s2787_s4  ;;  %v1122_v0 = vld [vmem:[%s3224_s5 + $0x18] sm:$0xff] }
0x157d   :  { %v2502_v9 = vpack.c.bf16 %v1122_v0, %v1121_v22 }
0x157f   :  { %2503 = vmatpush3.bf16.msra.mxu1 %v2502_v9 }
0x1580   :  { %997 = vrot.lane.b32.xlu0 %v995_v45, %s2787_s4  ;;  %2510 = vmatprep.subr.bf16.mxu1 %v2783_v4 }
0x15e6   :  { %v1109_v15 = vpop.permute.xlu0 %1108 }
0x15e7   :  { %v1111_v16 = vmul.f32 %v2625_v56, %v1109_v15 }
0x15e9   :  { %1113 = vrot.lane.b32.xlu1 %v1111_v16, %s2787_s4 }
0x15ea   :  { %v534_v14 = vpop.permute.xlu0 %533 }
0x15eb   :  { %537 = vst.msk [vmem:[#allocation3] sm:$0x4] %vm536_vm6, %v534_v14 }
0x15ee   :  { %v766_v17 = vpop.permute.xlu0 %765 }
0x15ef   :  { %769 = vst.msk [vmem:[#allocation3] sm:$0x10] %vm768_vm7, %v766_v17 }
0x15f2   :  { %v998_v18 = vpop.permute.xlu0 %997 }
0x15f3   :  { %1001 = vst.msk [vmem:[#allocation3] sm:$0x40] %vm1000_vm8, %v998_v18 }
0x165b   :  { %v1114_v19 = vpop.permute.xlu1 %1113 }
0x165c   :  { %1117 = vst.msk [vmem:[#allocation3] sm:$0x80] %vm1116_vm9, %v1114_v19 }
0x1663   :  { %v1118_v20 = vld [vmem:[#allocation3] sm:$0xff] }
0x1664   :  { %2354 = vmatmul.mubr.msk.f32.vlgmr.msra.gmra.mrb[8].mxu1 %vm128_vm2, %v1118_v20 }
0x1665   :  { %2512 = vmatpush3.bf16.msra.mxu1 %v3088_v8  ;;  %2375 = vmatprep.mubr.msk.f32.mxu1 %vm2784_vm0, %v2785_v12 }
0x1666   :  { %2513 = vmatprep.subr.bf16.mxu1 %v2783_v4 }
0x1669   :  { %2515 = vmatpush3.bf16.msra.mxu1 %v3098_v13 }
0x166a   :  { %2522 = vmatprep.subr.bf16.mxu1 %v2783_v4 }
0x1737   :  { %v1199_v25 = vpop.f32.mrb[8].mxu1 }
0x1738   :  { %v3120_v26 = vadd.f32 %v2137_v24, %v1199_v25  ;;  %v2355_v27 = vpop.f32.mrb[9].mxu1 }
0x173a   :  { %v1277_v29 = vadd.f32 %v1273_v21, %v3120_v26 }
0x173c   :  { %2628 = vtanh.f32 %v1277_v29  ;;  %v2139_v31 = vmul.f32 -1.442695, %v1277_v29 }
0x173e   :  { %2630 = vpow2.f32 %v2139_v31 }
0x1746   :  { %v2629_v30 = vpop.eup %2628 }
0x1747   :  { %1287 = vrot.lane.b32.xlu0 %v2629_v30, %s2786_s28 }
0x1748   :  { %v2631_v32 = vpop.eup %2630 }
0x1749   :  { %v1281_v33 = vadd.f32 1.0, %v2631_v32 }
0x174b   :  { %2632 = vrcp.f32 %v1281_v33 }
0x1755   :  { %v2633_v34 = vpop.eup %2632 }
0x1756   :  { %v1285_v37 = vmul.f32 0.0, %v2633_v34 }
0x17b9   :  { %v1288_v35 = vpop.permute.xlu0 %1287 }
0x17ba   :  { %v1290_v36 = vmul.f32 %v2633_v34, %v1288_v35 }
0x17bc   :  { %1292 = vrot.lane.b32.xlu1 %v1290_v36, %s2787_s4 }
0x182e   :  { %v1293_v38 = vpop.permute.xlu1 %1292 }
0x182f   :  { %v1295_v39 = vadd.f32 %v1293_v38, %v1285_v37 }
0x1831   :  { %2634 = vtanh.f32 %v1295_v39  ;;  %v1389_v56 = vrot.slane %v1295_v39, 7 }
0x183b   :  { %v2635_v40 = vpop.eup %2634 }
0x183c   :  { %1298 = vrot.lane.b32.xlu0 %v2635_v40, %s2786_s28 }
0x18ae   :  { %v1299_v41 = vpop.permute.xlu0 %1298 }
0x18af   :  { %v1301_v42 = vmul.f32 %v2633_v34, %v1299_v41 }
0x18b1   :  { %1303 = vrot.lane.b32.xlu1 %v1301_v42, %s2787_s4 }
0x1923   :  { %v1304_v44 = vpop.permute.xlu1 %1303 }
0x1924   :  { %2376 = vmatmul.mubr.msk.f32.vlgmr.msra.gmra.mrb[10].mxu1 %vm128_vm2, %v1304_v44 }
0x1925   :  { %2524 = vmatpush3.bf16.msra.mxu1 %v3088_v8  ;;  %2397 = vmatprep.mubr.msk.f32.mxu1 %vm2784_vm0, %v2785_v12 }
0x1926   :  { %2525 = vmatprep.subr.bf16.mxu1 %v2783_v4 }
0x1929   :  { %2527 = vmatpush3.bf16.msra.mxu1 %v3098_v13 }
0x192a   :  { %2534 = vmatprep.subr.bf16.mxu1 %v2783_v4 }
0x19f7   :  { %v1373_v45 = vpop.f32.mrb[10].mxu1 }
0x19f8   :  { %v1378_v46 = vrot.slane %v1373_v45, 7  ;;  %v2377_v47 = vpop.f32.mrb[11].mxu1 }
0x19fa   :  { %v1380_v48 = vadd.f32 %v1378_v46, %v3120_v26 }
0x19fc   :  { %2636 = vtanh.f32 %v1380_v48  ;;  %v2141_v50 = vmul.f32 -1.442695, %v1380_v48 }
0x19fe   :  { %2638 = vpow2.f32 %v2141_v50 }
0x1a06   :  { %v2637_v49 = vpop.eup %2636 }
0x1a07   :  { %1393 = vrot.lane.b32.xlu0 %v2637_v49, %s2786_s28 }
0x1a08   :  { %v2639_v51 = vpop.eup %2638 }
0x1a09   :  { %v1384_v52 = vadd.f32 1.0, %v2639_v51 }
0x1a0b   :  { %2640 = vrcp.f32 %v1384_v52 }
0x1a15   :  { %v2641_v53 = vpop.eup %2640 }
0x1a16   :  { %v1391_v57 = vmul.f32 %v2641_v53, %v1389_v56 }
0x1a79   :  { %v1394_v54 = vpop.permute.xlu0 %1393 }
0x1a7a   :  { %v1396_v55 = vmul.f32 %v2641_v53, %v1394_v54 }
0x1a7c   :  { %1398 = vrot.lane.b32.xlu1 %v1396_v55, %s2787_s4 }
0x1aee   :  { %v1399_v58 = vpop.permute.xlu1 %1398 }
0x1aef   :  { %v1401_v28 = vadd.f32 %v1399_v58, %v1391_v57 }
0x1af1   :  { %2642 = vtanh.f32 %v1401_v28  ;;  %v1496_v11 = vrot.slane %v1401_v28, 7 }
0x1afb   :  { %v2643_v59 = vpop.eup %2642 }
0x1afc   :  { %1404 = vrot.lane.b32.xlu0 %v2643_v59, %s2786_s28 }
0x1b6e   :  { %v1405_v60 = vpop.permute.xlu0 %1404 }
0x1b6f   :  { %v1407_v61 = vmul.f32 %v2641_v53, %v1405_v60 }
0x1b71   :  { %v1409_v63 = vrot.slane %v1407_v61, 1 }
0x1b73   :  { %1410 = vrot.lane.b32.xlu1 %v1409_v63, %s2787_s4 }
0x1be5   :  { %v1411_v1 = vpop.permute.xlu1 %1410 }
0x1be6   :  { %2387 = vmatmul.mubr.msk.f32.vlgmr.msra.gmra.mrb[12].mxu0 %vm128_vm2, %v1411_v1 }
0x1be7   :  { %2530 = vmatpush3.bf16.msra.mxu0 %v3088_v8  ;;  %2408 = vmatprep.mubr.msk.f32.mxu0 %vm2784_vm0, %v2785_v12 }
0x1be8   :  { %2531 = vmatprep.subr.bf16.mxu0 %v2783_v4 }
0x1beb   :  { %2533 = vmatpush3.bf16.msra.mxu0 %v3098_v13 }
0x1bec   :  { %2540 = vmatprep.subr.bf16.mxu0 %v2783_v4 }
0x1cb9   :  { %v1480_v2 = vpop.f32.mrb[12].mxu0 }
0x1cba   :  { %v1485_v3 = vrot.slane %v1480_v2, 6  ;;  %v2388_v62 = vpop.f32.mrb[13].mxu0 }
0x1cbc   :  { %v1487_v43 = vadd.f32 %v1485_v3, %v3120_v26 }
0x1cbe   :  { %2644 = vtanh.f32 %v1487_v43  ;;  %v2143_v6 = vmul.f32 -1.442695, %v1487_v43 }
0x1cc0   :  { %2646 = vpow2.f32 %v2143_v6 }
0x1cc8   :  { %v2645_v5 = vpop.eup %2644 }
0x1cc9   :  { %1500 = vrot.lane.b32.xlu0 %v2645_v5, %s2786_s28 }
0x1cca   :  { %v2647_v7 = vpop.eup %2646 }
0x1ccb   :  { %v1491_v22 = vadd.f32 1.0, %v2647_v7 }
0x1ccd   :  { %2648 = vrcp.f32 %v1491_v22 }
0x1cd7   :  { %v2649_v0 = vpop.eup %2648 }
0x1cd8   :  { %v1498_v15 = vmul.f32 %v2649_v0, %v1496_v11 }
0x1d3b   :  { %v1501_v10 = vpop.permute.xlu0 %1500 }
0x1d3c   :  { %v1503_v9 = vmul.f32 %v2649_v0, %v1501_v10 }
0x1d3e   :  { %1505 = vrot.lane.b32.xlu1 %v1503_v9, %s2787_s4 }
0x1db0   :  { %v1506_v16 = vpop.permute.xlu1 %1505 }
0x1db1   :  { %v1508_v14 = vadd.f32 %v1506_v16, %v1498_v15 }
0x1db3   :  { %2650 = vtanh.f32 %v1508_v14  ;;  %v1603_v36 = vrot.slane %v1508_v14, 7 }
0x1dbd   :  { %v2651_v17 = vpop.eup %2650 }
0x1dbe   :  { %1511 = vrot.lane.b32.xlu0 %v2651_v17, %s2786_s28 }
0x1e30   :  { %v1512_v18 = vpop.permute.xlu0 %1511 }
0x1e31   :  { %v1514_v19 = vmul.f32 %v2649_v0, %v1512_v18 }
0x1e33   :  { %v1516_v20 = vrot.slane %v1514_v19, 2 }
0x1e35   :  { %1517 = vrot.lane.b32.xlu1 %v1516_v20, %s2787_s4 }
0x1ea7   :  { %v1518_v21 = vpop.permute.xlu1 %1517 }
0x1ea8   :  { %2398 = vmatmul.mubr.msk.f32.vlgmr.msra.gmra.mrb[12].mxu1 %vm128_vm2, %v1518_v21 }
0x1ea9   :  { %2536 = vmatpush3.bf16.msra.mxu1 %v3088_v8  ;;  %2419 = vmatprep.mubr.msk.f32.mxu1 %vm2784_vm0, %v2785_v12 }
0x1eaa   :  { %2537 = vmatprep.subr.bf16.mxu1 %v2783_v4 }
0x1ead   :  { %2539 = vmatpush3.bf16.msra.mxu1 %v3098_v13 }
0x1eae   :  { %2546 = vmatprep.subr.bf16.mxu1 %v2783_v4 }
0x1f7b   :  { %v1587_v23 = vpop.f32.mrb[12].mxu1 }
0x1f7c   :  { %v1592_v24 = vrot.slane %v1587_v23, 5  ;;  %v2399_v25 = vpop.f32.mrb[13].mxu1 }
0x1f7e   :  { %v1594_v27 = vadd.f32 %v1592_v24, %v3120_v26 }
0x1f80   :  { %2652 = vtanh.f32 %v1594_v27  ;;  %v2145_v30 = vmul.f32 -1.442695, %v1594_v27 }
0x1f82   :  { %2654 = vpow2.f32 %v2145_v30 }
0x1f8a   :  { %v2653_v29 = vpop.eup %2652 }
0x1f8b   :  { %1607 = vrot.lane.b32.xlu0 %v2653_v29, %s2786_s28 }
0x1f8c   :  { %v2655_v31 = vpop.eup %2654 }
0x1f8d   :  { %v1598_v32 = vadd.f32 1.0, %v2655_v31 }
0x1f8f   :  { %2656 = vrcp.f32 %v1598_v32 }
0x1f99   :  { %v2657_v33 = vpop.eup %2656 }
0x1f9a   :  { %v1605_v37 = vmul.f32 %v2657_v33, %v1603_v36 }
0x1ffd   :  { %v1608_v34 = vpop.permute.xlu0 %1607 }
0x1ffe   :  { %v1610_v35 = vmul.f32 %v2657_v33, %v1608_v34 }
0x2000   :  { %1612 = vrot.lane.b32.xlu1 %v1610_v35, %s2787_s4 }
0x2072   :  { %v1613_v38 = vpop.permute.xlu1 %1612 }
0x2073   :  { %v1615_v39 = vadd.f32 %v1613_v38, %v1605_v37 }
0x2075   :  { %2658 = vtanh.f32 %v1615_v39  ;;  %v1710_v57 = vrot.slane %v1615_v39, 7 }
0x207f   :  { %v2659_v40 = vpop.eup %2658 }
0x2080   :  { %1618 = vrot.lane.b32.xlu0 %v2659_v40, %s2786_s28 }
0x20f2   :  { %v1619_v41 = vpop.permute.xlu0 %1618 }
0x20f3   :  { %v1621_v42 = vmul.f32 %v2657_v33, %v1619_v41 }
0x20f5   :  { %v1623_v44 = vrot.slane %v1621_v42, 3 }
0x20f7   :  { %1624 = vrot.lane.b32.xlu1 %v1623_v44, %s2787_s4 }
0x2169   :  { %v1625_v45 = vpop.permute.xlu1 %1624 }
0x216a   :  { %2409 = vmatmul.mubr.msk.f32.vlgmr.msra.gmra.mrb[14].mxu0 %vm128_vm2, %v1625_v45 }
0x216b   :  { %2542 = vmatpush3.bf16.msra.mxu0 %v3088_v8  ;;  %2430 = vmatprep.mubr.msk.f32.mxu0 %vm2784_vm0, %v2785_v12 }
0x216c   :  { %2543 = vmatprep.subr.bf16.mxu0 %v2783_v4 }
0x216f   :  { %2545 = vmatpush3.bf16.msra.mxu0 %v3098_v13 }
0x223d   :  { %v1694_v46 = vpop.f32.mrb[14].mxu0 }
0x223e   :  { %v1699_v47 = vrot.slane %v1694_v46, 4  ;;  %v2410_v48 = vpop.f32.mrb[15].mxu0 }
0x2240   :  { %v1701_v49 = vadd.f32 %v1699_v47, %v3120_v26 }
0x2242   :  { %2660 = vtanh.f32 %v1701_v49  ;;  %v2147_v51 = vmul.f32 -1.442695, %v1701_v49 }
0x2244   :  { %2662 = vpow2.f32 %v2147_v51 }
0x224c   :  { %v2661_v50 = vpop.eup %2660 }
0x224d   :  { %1714 = vrot.lane.b32.xlu0 %v2661_v50, %s2786_s28 }
0x224e   :  { %v2663_v52 = vpop.eup %2662 }
0x224f   :  { %v1705_v53 = vadd.f32 1.0, %v2663_v52 }
0x2251   :  { %2664 = vrcp.f32 %v1705_v53 }
0x225b   :  { %v2665_v54 = vpop.eup %2664 }
0x225c   :  { %v1712_v58 = vmul.f32 %v2665_v54, %v1710_v57 }
0x22bf   :  { %v1715_v55 = vpop.permute.xlu0 %1714 }
0x22c0   :  { %v1717_v56 = vmul.f32 %v2665_v54, %v1715_v55 }
0x22c2   :  { %1719 = vrot.lane.b32.xlu1 %v1717_v56, %s2787_s4 }
0x2334   :  { %v1720_v28 = vpop.permute.xlu1 %1719 }
0x2335   :  { %v1722_v59 = vadd.f32 %v1720_v28, %v1712_v58  ;;  %v2067_v58 = vld [vmem:[%s3230_s11] sm:$0x1] }
0x2336   :  { %v2068_v28 = vld [vmem:[%s3228_s9] sm:$0x1] }
0x2337   :  { %2666 = vtanh.f32 %v1722_v59 }
0x2341   :  { %v2667_v60 = vpop.eup %2666 }
0x2342   :  { %1725 = vrot.lane.b32.xlu0 %v2667_v60, %s2786_s28 }
0x23b4   :  { %v1726_v61 = vpop.permute.xlu0 %1725 }
0x23b5   :  { %v1728_v63 = vmul.f32 %v2665_v54, %v1726_v61  ;;  %v2154_v54 = vld [vmem:[%s3227_s8] ss:$0 sm:$0xff]  ;;  %s2789_s8 = smov [#allocation12]  }
0x23b6   :  { %s2094_s9 = sshll.u32 %s2789_s8, 4  ;;  %s2095_s9 = int_to_ptr.vmem [resolvable:$true] %s2094_s9 }
0x23b7   :  { %v1730_v1 = vrot.slane %v1728_v63, 4  ;;  %s2748_s11 = scalar_lea.vmem %s2095_s9, 16  ;;  %s2752_s29 = scalar_lea.vmem %s2095_s9, 32 }
0x23b8   :  { %p2749_p7 = scmp.ne.s32.totalorder %s2095_s9, %s2748_s11  ;;  %p2753_p8 = scmp.lt.s32.totalorder %s2095_s9, %s2095_s9 }
0x23b9   :  { %1731 = vrot.lane.b32.xlu1 %v1730_v1, %s2787_s4  ;;  %p2754_p9 = scmp.lt.s32.totalorder %s2752_s29, %s2748_s11 }
0x23bb   :  { %p2755_p10 = por %p2754_p9, %p2753_p8 }
0x23bd   :  { %p2756_p11 = pnand %p2755_p10, %p2749_p7 }
0x242b   :  { %v1732_v2 = vpop.permute.xlu1 %1731 }
0x242c   :  { %2420 = vmatmul.mubr.msk.f32.vlgmr.msra.gmra.mrb[14].mxu1 %vm128_vm2, %v1732_v2 }
0x242d   :  { %2548 = vmatpush3.bf16.msra.mxu1 %v3088_v8  ;;  %2441 = vmatprep.mubr.msk.f32.mxu1 %vm2784_vm0, %v2785_v12 }
0x242e   :  { %2549 = vmatprep.subr.bf16.mxu1 %v2783_v4  ;;  %v1817_v4 = vrot.slane %v1722_v59, 7  ;;  %v2069_v59 = vmul.f32 %v2068_v28, %v2067_v58 }
0x2430   :  { %v2071_v60 = vsel %vm2070_vm10, %v2069_v59, 0.0 }
0x2431   :  { %2551 = vmatpush3.bf16.msra.mxu1 %v3098_v13 }
0x24ff   :  { %v1801_v3 = vpop.f32.mrb[14].mxu1 }
0x2500   :  { %v1806_v62 = vrot.slane %v1801_v3, 3  ;;  %v2421_v43 = vpop.f32.mrb[15].mxu1 }
0x2502   :  { %v1808_v5 = vadd.f32 %v1806_v62, %v3120_v26 }
0x2504   :  { %2668 = vtanh.f32 %v1808_v5  ;;  %v2149_v7 = vmul.f32 -1.442695, %v1808_v5 }
0x2506   :  { %2670 = vpow2.f32 %v2149_v7 }
0x250e   :  { %v2669_v6 = vpop.eup %2668 }
0x250f   :  { %1821 = vrot.lane.b32.xlu0 %v2669_v6, %s2786_s28 }
0x2510   :  { %v2671_v22 = vpop.eup %2670 }
0x2511   :  { %v1812_v8 = vadd.f32 1.0, %v2671_v22  ;;  %v2155_v22 = vld [vmem:[#allocation4] ss:$0 sm:$0xff] }
0x2513   :  { %2672 = vrcp.f32 %v1812_v8 }
0x251d   :  { %v2673_v0 = vpop.eup %2672 }
0x251e   :  { %v1819_v13 = vmul.f32 %v2673_v0, %v1817_v4 }
0x2581   :  { %v1822_v12 = vpop.permute.xlu0 %1821 }
0x2582   :  { %v1824_v10 = vmul.f32 %v2673_v0, %v1822_v12 }
0x2584   :  { %1826 = vrot.lane.b32.xlu1 %v1824_v10, %s2787_s4 }
0x25f6   :  { %v1827_v9 = vpop.permute.xlu1 %1826 }
0x25f7   :  { %v1829_v11 = vadd.f32 %v1827_v9, %v1819_v13 }
0x25f9   :  { %2674 = vtanh.f32 %v1829_v11  ;;  %v1924_v33 = vrot.slane %v1829_v11, 7 }
0x2603   :  { %v2675_v15 = vpop.eup %2674 }
0x2604   :  { %1832 = vrot.lane.b32.xlu0 %v2675_v15, %s2786_s28 }
0x2676   :  { %v1833_v16 = vpop.permute.xlu0 %1832 }
0x2677   :  { %v1835_v14 = vmul.f32 %v2673_v0, %v1833_v16 }
0x2679   :  { %v1837_v17 = vrot.slane %v1835_v14, 5 }
0x267b   :  { %1838 = vrot.lane.b32.xlu1 %v1837_v17, %s2787_s4 }
0x26ed   :  { %v1839_v18 = vpop.permute.xlu1 %1838 }
0x26ee   :  { %2431 = vmatmul.mubr.msk.f32.vlgmr.msra.gmra.mrb[16].mxu0 %vm128_vm2, %v1839_v18 }
0x27c1   :  { %v1908_v19 = vpop.f32.mrb[16].mxu0 }
0x27c2   :  { %v1913_v20 = vrot.slane %v1908_v19, 2  ;;  %v2432_v21 = vpop.f32.mrb[17].mxu0 }
0x27c4   :  { %v1915_v23 = vadd.f32 %v1913_v20, %v3120_v26 }
0x27c6   :  { %2676 = vtanh.f32 %v1915_v23  ;;  %v2151_v25 = vmul.f32 -1.442695, %v1915_v23 }
0x27c8   :  { %2678 = vpow2.f32 %v2151_v25 }
0x27d0   :  { %v2677_v24 = vpop.eup %2676 }
0x27d1   :  { %1928 = vrot.lane.b32.xlu0 %v2677_v24, %s2786_s28 }
0x27d2   :  { %v2679_v27 = vpop.eup %2678 }
0x27d3   :  { %v1919_v29 = vadd.f32 1.0, %v2679_v27 }
0x27d5   :  { %2680 = vrcp.f32 %v1919_v29 }
0x27df   :  { %v2681_v30 = vpop.eup %2680 }
0x27e0   :  { %v1926_v34 = vmul.f32 %v2681_v30, %v1924_v33 }
0x2843   :  { %v1929_v31 = vpop.permute.xlu0 %1928 }
0x2844   :  { %v1931_v32 = vmul.f32 %v2681_v30, %v1929_v31 }
0x2846   :  { %1933 = vrot.lane.b32.xlu1 %v1931_v32, %s2787_s4 }
0x28b8   :  { %v1934_v35 = vpop.permute.xlu1 %1933 }
0x28b9   :  { %v1936_v36 = vadd.f32 %v1934_v35, %v1926_v34 }
0x28bb   :  { %2682 = vtanh.f32 %v1936_v36 }
0x28c5   :  { %v2683_v37 = vpop.eup %2682 }
0x28c6   :  { %1939 = vrot.lane.b32.xlu0 %v2683_v37, %s2786_s28 }
0x2938   :  { %v1940_v38 = vpop.permute.xlu0 %1939 }
0x2939   :  { %v1942_v39 = vmul.f32 %v2681_v30, %v1940_v38 }
0x293b   :  { %v1944_v40 = vrot.slane %v1942_v39, 6 }
0x293d   :  { %1945 = vrot.lane.b32.xlu1 %v1944_v40, %s2787_s4 }
0x29af   :  { %v1946_v41 = vpop.permute.xlu1 %1945 }
0x29b0   :  { %2442 = vmatmul.mubr.msk.f32.vlgmr.msra.gmra.mrb[16].mxu1 %vm128_vm2, %v1946_v41 }
0x2a83   :  { %v2015_v42 = vpop.f32.mrb[16].mxu1 }
0x2a84   :  { %v2020_v44 = vrot.slane %v2015_v42, 1  ;;  %v2443_v45 = vpop.f32.mrb[17].mxu1 }
0x2a86   :  { %v2022_v46 = vadd.f32 %v2020_v44, %v3120_v26  ;;  %v2031_v26 = vrot.slane %v1936_v36, 7 }
0x2a88   :  { %2684 = vtanh.f32 %v2022_v46  ;;  %v2153_v48 = vmul.f32 -1.442695, %v2022_v46 }
0x2a8a   :  { %2686 = vpow2.f32 %v2153_v48 }
0x2a92   :  { %v2685_v47 = vpop.eup %2684 }
0x2a93   :  { %2035 = vrot.lane.b32.xlu0 %v2685_v47, %s2786_s28 }
0x2a94   :  { %v2687_v49 = vpop.eup %2686 }
0x2a95   :  { %v2026_v50 = vadd.f32 1.0, %v2687_v49 }
0x2a97   :  { %2688 = vrcp.f32 %v2026_v50 }
0x2aa1   :  { %v2689_v51 = vpop.eup %2688 }
0x2aa2   :  { %v2033_v55 = vmul.f32 %v2689_v51, %v2031_v26 }
0x2b05   :  { %v2036_v52 = vpop.permute.xlu0 %2035 }
0x2b06   :  { %v2038_v53 = vmul.f32 %v2689_v51, %v2036_v52 }
0x2b08   :  { %2040 = vrot.lane.b32.xlu1 %v2038_v53, %s2787_s4 }
0x2b0c   :  { %2056 = vrot.lane.b32.xlu1 %v2154_v54, %s2788_s24 }
0x2b30   :  { %2072 = vadd.xlane.f32.xlu1 %v2071_v60 }
0x2b7a   :  { %v2041_v56 = vpop.permute.xlu1 %2040 }
0x2b7b   :  { %v2043_v57 = vadd.f32 %v2041_v56, %v2033_v55 }
0x2b7d   :  { %2690 = vtanh.f32 %v2043_v57 }
0x2b7e   :  { %v2057_v1 = vpop.permute.xlu1 %2056 }
0x2b87   :  { %v2691_v61 = vpop.eup %2690 }
0x2b88   :  { %2046 = vrot.lane.b32.xlu0 %v2691_v61, %s2786_s28 }
0x2bbd   :  { %v2073_v5 = vpop.xlane.xlu1 %2072 }
0x2bbe   :  { %v2075_v6 = vrot.slane %v2073_v5, 1 }
0x2bfa   :  { %v2047_v63 = vpop.permute.xlu0 %2046 }
0x2bfb   :  { %v2049_v2 = vmul.f32 %v2689_v51, %v2047_v63 }
0x2bfd   :  { %v2059_v3 = vmul.f32 %v2057_v1, %v2049_v2 }
0x2bff   :  { %2061 = vrot.lane.b32.xlu0 %v2059_v3, %s2787_s4 }
0x2c71   :  { %v2062_v62 = vpop.permute.xlu0 %2061 }
0x2c72   :  { %v2064_v43 = vsel %vm1116_vm9, %v2062_v62, 0.0 }
0x2c73   :  { %2065 = vadd.xlane.f32.xlu0 %v2064_v43 }
0x2d00   :  { %v2066_v7 = vpop.xlane.xlu0 %2065 }
0x2d01   :  { %v2077_v8 = vadd.f32 %v2075_v6, %v2066_v7 }
0x2d03   :  { %v2085_v0 = vadd.f32 %v2155_v22, %v2077_v8 }
0x2d05   :  { %2087 = vst.msk [vmem:[#allocation12 - $0x7] sm:$0x80] %vm2086_vm11, %v2085_v0 }
0x2d06   :  { %2759 = shalt.err (!%p2756_p11)
}
0x2d07   :  { %s2760_s15 = scalar_lea.hbm %s3231_s12, 16 }
0x2d08   :  { %p2761_p12 = scmp.ne.s32.totalorder %s3231_s12, %s2760_s15  ;;  %p2764_p13 = scmp.lt.u32.totalorder %s2760_s15, %s3231_s12 }
0x2d0a   :  { %p2766_p0 = pnand %p2764_p13, %p2761_p12 }
0x2d0c   :  { %2769 = shalt.err (!%p2766_p0)
}
0x2d0d   :  { %2097 = dma.vmem_to_hbm [thread:$0]  %s2095_s9, 16, %s3231_s12, [#allocation7]  }
0x2d0e   :  { %2776 = dma.done.wait [#allocation7], 16  }
0x2d0f   :  { %2777 = vsyncadd [#allocation7], 4294967280 }
0x2d10   :  { %2101 = vsyncpa [#allocation6], 1 }
0x2d11   :  { %2102 = vsyncpa [#allocation11], 1 }
0x2d12   :  { %2103 = vsyncpa [#allocation7], 1 }
0x2d13   :  { %2104 = vsyncpa [#allocation8], 1 }

</bundles_post_ra>
